<compile_context>
chip_gen: v6e
topology: v6e:2x2x1
jax: 0.10.0
libtpu: 0.0.40
codegen_flags: <defaults>
</compile_context>

<pallas_src>
import functools
import math

import jax
import jax.numpy as jnp
from jax.experimental import pallas as pl
from jax.experimental.pallas import tpu as pltpu

# ---- static problem config (small, consistent with the module) ----
B = 2      # batch
T = 8      # maxlen_out (decoder length)
S = 16     # maxlen_in  (encoder/memory length)
D = 32     # size (model dim)
H = 4      # attention heads
DK = D // H
F = 64     # feed-forward hidden dim
LN_EPS = 1e-12   # espnet LayerNorm default
MASK_BIG = 1e30  # additive mask magnitude (exp underflows to exactly 0)


def _batch_block() -> int:
    """Batch elements processed per grid step.

    v7x has 2 TensorCores per chip -> keep one batch element per (parallel) grid step.
    Single-TC chips (v5e/v6e) -> collapse the batch grid into one step to avoid the
    ~0.35us fixed per-step pipeline overhead.
    """
    try:
        kind = jax.devices()[0].device_kind.lower()
    except Exception:
        return B
    return 1 if "v7" in kind else B


def decoder_layer_kernel(
    bb,
    tgt_ref, tmask_ref, mem_ref, mmask_ref,
    ln_g_ref, ln_b_ref,
    sa_wqkv_ref, sa_bqkv_ref, sa_wo_ref, sa_bo_ref,
    ca_wq_ref, ca_bq_ref, ca_wkv_ref, ca_bkv_ref, ca_wo_ref, ca_bo_ref,
    w1_ref, b1_ref, w2_ref, b2_ref,
    out_ref,
):
    x = tgt_ref[...].reshape(bb * T, D)      # (bb*T, D)
    mem = mem_ref[...].reshape(bb * S, D)    # (bb*S, D)

    def layer_norm(v, idx):
        g = ln_g_ref[idx]                    # (D,)
        b = ln_b_ref[idx]                    # (D,)
        mu = jnp.mean(v, axis=-1, keepdims=True)
        var = jnp.mean((v - mu) ** 2, axis=-1, keepdims=True)
        return (v - mu) * jax.lax.rsqrt(var + LN_EPS) * g + b

    def mha(q_full, k_full, v_full, mask_list, Tq, Tk):
        """Multi-head attention on flattened slabs.

        q_full: (bb*Tq, D); k_full, v_full: (bb*Tk, D); mask_list: bb arrays (Tq, Tk),
        1.0 = keep / 0.0 = mask. 1/sqrt(d_k) already folded into the Q projection.
        Returns ctx (bb*Tq, D) ready for the single output projection.
        """
        # Per-(batch, head) score blocks, stacked along sublanes -> one softmax.
        s_blocks = []
        for b in range(bb):
            qb = q_full[b * Tq:(b + 1) * Tq]
            kb = k_full[b * Tk:(b + 1) * Tk]
            for h in range(H):
                lo, hi = h * DK, (h + 1) * DK
                s_blocks.append(jax.lax.dot_general(       # (Tq, Tk), no explicit k.T
                    qb[:, lo:hi], kb[:, lo:hi],
                    dimension_numbers=(((1,), (1,)), ((), ())),
                    preferred_element_type=jnp.float32))
        s = jnp.concatenate(s_blocks, axis=0)               # (bb*H*Tq, Tk)

        mask = jnp.concatenate([m for m in mask_list for _ in range(H)], axis=0)
        keep = (mask > 0).astype(jnp.float32)               # (bb*H*Tq, Tk)

        s = s + (keep - 1.0) * MASK_BIG                     # additive -1e30 mask bias
        mx = jnp.max(s, axis=-1, keepdims=True)
        p = jnp.exp(s - mx)
        p = p * pl.reciprocal(jnp.sum(p, axis=-1, keepdims=True), approx=False)
        p = p * keep                                        # espnet: zero masked probs

        rows = []
        for b in range(bb):
            vb = v_full[b * Tk:(b + 1) * Tk]
            heads = []
            for h in range(H):
                lo, hi = h * DK, (h + 1) * DK
                pr = p[(b * H + h) * Tq:(b * H + h + 1) * Tq]
                heads.append(jnp.dot(pr, vb[:, lo:hi],
                                     preferred_element_type=jnp.float32))
            rows.append(jnp.concatenate(heads, axis=1))     # (Tq, D)
        return jnp.concatenate(rows, axis=0)                # (bb*Tq, D)

    # ---- block 1: self-attention (pre-norm, residual) ----
    xn = layer_norm(x, 0)
    qkv = jnp.dot(xn, sa_wqkv_ref[...],
                  preferred_element_type=jnp.float32) + sa_bqkv_ref[...]   # (bb*T, 3D)
    keep_self = [tmask_ref[b] for b in range(bb)]                          # (T, T) each
    ctx = mha(qkv[:, 0:D], qkv[:, D:2 * D], qkv[:, 2 * D:3 * D], keep_self, T, T)
    x = x + jnp.dot(ctx, sa_wo_ref[...],
                    preferred_element_type=jnp.float32) + sa_bo_ref[...]

    # ---- block 2: source (cross) attention ----
    xn = layer_norm(x, 1)
    q_all = jnp.dot(xn, ca_wq_ref[...],
                    preferred_element_type=jnp.float32) + ca_bq_ref[...]   # (bb*T, D)
    kv_all = jnp.dot(mem, ca_wkv_ref[...],
                     preferred_element_type=jnp.float32) + ca_bkv_ref[...]  # (bb*S, 2D)
    keep_src = [jnp.broadcast_to(mmask_ref[b], (T, S)) for b in range(bb)]  # (T, S) each
    ctx = mha(q_all, kv_all[:, 0:D], kv_all[:, D:2 * D], keep_src, T, S)
    x = x + jnp.dot(ctx, ca_wo_ref[...],
                    preferred_element_type=jnp.float32) + ca_bo_ref[...]

    # ---- block 3: position-wise feed-forward (Linear -> ReLU -> Linear) ----
    xn = layer_norm(x, 2)
    h1 = jnp.maximum(
        jnp.dot(xn, w1_ref[...], preferred_element_type=jnp.float32) + b1_ref[...], 0.0)
    x = x + jnp.dot(h1, w2_ref[...], preferred_element_type=jnp.float32) + b2_ref[...]

    out_ref[...] = x.reshape(bb, T, D).astype(out_ref.dtype)


def decoder_layer(tgt, tgt_mask, memory, memory_mask, params):
    (ln_g, ln_b, sa_w, sa_b, ca_w, ca_b, w1, b1, w2, b2) = params
    scale = 1.0 / math.sqrt(DK)

    # ---- wrapper-side constant folding (fused projections, folded 1/sqrt(d_k)) ----
    sa_wqkv = jnp.concatenate([sa_w[0] * scale, sa_w[1], sa_w[2]], axis=1)      # (D, 3D)
    sa_bqkv = jnp.concatenate([sa_b[0] * scale, sa_b[1], sa_b[2]])[None, :]     # (1, 3D)
    sa_wo = sa_w[3]                                                             # (D, D)
    sa_bo = sa_b[3][None, :]                                                    # (1, D)
    ca_wq = ca_w[0] * scale                                                     # (D, D)
    ca_bq = (ca_b[0] * scale)[None, :]                                          # (1, D)
    ca_wkv = jnp.concatenate([ca_w[1], ca_w[2]], axis=1)                        # (D, 2D)
    ca_bkv = jnp.concatenate([ca_b[1], ca_b[2]])[None, :]                       # (1, 2D)
    ca_wo = ca_w[3]
    ca_bo = ca_b[3][None, :]

    bb = _batch_block()
    grid = (B // bb,)
    act3 = lambda i: (i, 0, 0)
    const2 = lambda i: (0, 0)

    x = pl.pallas_call(
        functools.partial(decoder_layer_kernel, bb),
        out_shape=jax.ShapeDtypeStruct((B, T, D), jnp.float32),
        grid_spec=pltpu.PrefetchScalarGridSpec(
            num_scalar_prefetch=0,
            grid=grid,
            in_specs=[
                pl.BlockSpec((bb, T, D), act3),      # tgt
                pl.BlockSpec((bb, T, T), act3),      # tgt_mask
                pl.BlockSpec((bb, S, D), act3),      # memory
                pl.BlockSpec((bb, 1, S), act3),      # memory_mask
                pl.BlockSpec((3, D), const2),        # LN gammas
                pl.BlockSpec((3, D), const2),        # LN betas
                pl.BlockSpec((D, 3 * D), const2),    # self-attn fused Wqkv (scaled q)
                pl.BlockSpec((1, 3 * D), const2),    # self-attn fused bias
                pl.BlockSpec((D, D), const2),        # self-attn Wo
                pl.BlockSpec((1, D), const2),        # self-attn bo
                pl.BlockSpec((D, D), const2),        # cross-attn Wq (scaled)
                pl.BlockSpec((1, D), const2),        # cross-attn bq (scaled)
                pl.BlockSpec((D, 2 * D), const2),    # cross-attn fused Wkv
                pl.BlockSpec((1, 2 * D), const2),    # cross-attn fused bkv
                pl.BlockSpec((D, D), const2),        # cross-attn Wo
                pl.BlockSpec((1, D), const2),        # cross-attn bo
                pl.BlockSpec((D, F), const2),        # FFN W1
                pl.BlockSpec((1, F), const2),        # FFN b1
                pl.BlockSpec((F, D), const2),        # FFN W2
                pl.BlockSpec((1, D), const2),        # FFN b2
            ],
            out_specs=pl.BlockSpec((bb, T, D), act3),
        ),
        compiler_params=pltpu.CompilerParams(dimension_semantics=("parallel",)),
    )(tgt, tgt_mask, memory, memory_mask,
      ln_g, ln_b,
      sa_wqkv, sa_bqkv, sa_wo, sa_bo,
      ca_wq, ca_bq, ca_wkv, ca_bkv, ca_wo, ca_bo,
      w1, b1, w2, b2)
    # Match PyTorch module's return signature: (x, tgt_mask, memory, memory_mask)
    return x, tgt_mask, memory, memory_mask


# ------------------- pure-JAX reference (for correctness check) -------------------
def _ref_ln(v, g, b):
    mu = jnp.mean(v, axis=-1, keepdims=True)
    var = jnp.mean((v - mu) ** 2, axis=-1, keepdims=True)
    return (v - mu) * jax.lax.rsqrt(var + LN_EPS) * g + b


def _ref_mha(q_in, kv_in, mask, W, b):
    neg = jnp.finfo(jnp.float32).min
    Bq, Tq, _ = q_in.shape
    Tk = kv_in.shape[1]
    q = (q_in @ W[0] + b[0]).reshape(Bq, Tq, H, DK).transpose(0, 2, 1, 3)
    k = (kv_in @ W[1] + b[1]).reshape(Bq, Tk, H, DK).transpose(0, 2, 1, 3)
    v = (kv_in @ W[2] + b[2]).reshape(Bq, Tk, H, DK).transpose(0, 2, 1, 3)
    s = q @ k.transpose(0, 1, 3, 2) / math.sqrt(DK)
    m = mask[:, None, :, :]
    s = jnp.where(m > 0, s, neg)
    p = jax.nn.softmax(s, axis=-1)
    p = jnp.where(m > 0, p, 0.0)
    ctx = (p @ v).transpose(0, 2, 1, 3).reshape(Bq, Tq, D)
    return ctx @ W[3] + b[3]


def decoder_layer_ref(tgt, tgt_mask, memory, memory_mask, params):
    (ln_g, ln_b, sa_w, sa_b, ca_w, ca_b, w1, b1, w2, b2) = params
    x = tgt
    xn = _ref_ln(x, ln_g[0], ln_b[0])
    x = x + _ref_mha(xn, xn, tgt_mask, sa_w, sa_b)
    xn = _ref_ln(x, ln_g[1], ln_b[1])
    x = x + _ref_mha(xn, memory, memory_mask, ca_w, ca_b)
    xn = _ref_ln(x, ln_g[2], ln_b[2])
    h1 = jnp.maximum(xn @ w1 + b1[0], 0.0)
    x = x + h1 @ w2 + b2[0]
    return x


if __name__ == "__main__":
    key = jax.random.PRNGKey(0)
    ks = jax.random.split(key, 12)

    tgt = jax.random.normal(ks[0], (B, T, D), jnp.float32)
    memory = jax.random.normal(ks[1], (B, S, D), jnp.float32)

    # causal self-attention mask (B, T, T)
    tgt_mask = jnp.tril(jnp.ones((T, T), jnp.float32))[None].repeat(B, axis=0)
    # encoder memory mask (B, 1, S) with per-batch lengths
    mem_lens = jnp.array([S, 11], jnp.int32)
    memory_mask = (jnp.arange(S)[None, :] < mem_lens[:, None]).astype(jnp.float32)[:, None, :]

    sc = 1.0 / math.sqrt(D)
    ln_g = jnp.ones((3, D), jnp.float32) + 0.01 * jax.random.normal(ks[2], (3, D))
    ln_b = 0.01 * jax.random.normal(ks[3], (3, D))
    sa_w = sc * jax.random.normal(ks[4], (4, D, D), jnp.float32)
    sa_b = 0.01 * jax.random.normal(ks[5], (4, D), jnp.float32)
    ca_w = sc * jax.random.normal(ks[6], (4, D, D), jnp.float32)
    ca_b = 0.01 * jax.random.normal(ks[7], (4, D), jnp.float32)
    w1 = sc * jax.random.normal(ks[8], (D, F), jnp.float32)
    b1 = 0.01 * jax.random.normal(ks[9], (1, F), jnp.float32)
    w2 = (1.0 / math.sqrt(F)) * jax.random.normal(ks[10], (F, D), jnp.float32)
    b2 = 0.01 * jax.random.normal(ks[11], (1, D), jnp.float32)

    params = (ln_g, ln_b, sa_w, sa_b, ca_w, ca_b, w1, b1, w2, b2)

    out, out_tmask, out_mem, out_mmask = jax.block_until_ready(
        decoder_layer(tgt, tgt_mask, memory, memory_mask, params)
    )

    ref = decoder_layer_ref(tgt, tgt_mask, memory, memory_mask, params)
    assert out.shape == (B, T, D)
    assert jnp.allclose(out, ref, atol=1e-4, rtol=1e-4), (
        float(jnp.max(jnp.abs(out - ref)))
    )
    print("KERNEL_OK")
</pallas_src>

<mosaic_0001>
module attributes {stable_mosaic.version = 11 : i64} {
  func.func @decoder_layer_kernel(%arg0: i32, %arg1: memref<2x8x32xf32, #tpu.memory_space<vmem>>, %arg2: memref<2x8x8xf32, #tpu.memory_space<vmem>>, %arg3: memref<2x16x32xf32, #tpu.memory_space<vmem>>, %arg4: memref<2x1x16xf32, #tpu.memory_space<vmem>>, %arg5: memref<3x32xf32, #tpu.memory_space<vmem>>, %arg6: memref<3x32xf32, #tpu.memory_space<vmem>>, %arg7: memref<32x96xf32, #tpu.memory_space<vmem>>, %arg8: memref<1x96xf32, #tpu.memory_space<vmem>>, %arg9: memref<32x32xf32, #tpu.memory_space<vmem>>, %arg10: memref<1x32xf32, #tpu.memory_space<vmem>>, %arg11: memref<32x32xf32, #tpu.memory_space<vmem>>, %arg12: memref<1x32xf32, #tpu.memory_space<vmem>>, %arg13: memref<32x64xf32, #tpu.memory_space<vmem>>, %arg14: memref<1x64xf32, #tpu.memory_space<vmem>>, %arg15: memref<32x32xf32, #tpu.memory_space<vmem>>, %arg16: memref<1x32xf32, #tpu.memory_space<vmem>>, %arg17: memref<32x64xf32, #tpu.memory_space<vmem>>, %arg18: memref<1x64xf32, #tpu.memory_space<vmem>>, %arg19: memref<64x32xf32, #tpu.memory_space<vmem>>, %arg20: memref<1x32xf32, #tpu.memory_space<vmem>>, %arg21: memref<2x8x32xf32, #tpu.memory_space<vmem>>) attributes {dimension_semantics = [#tpu.dimension_semantics<parallel>], iteration_bounds = array<i64: 1>, scalar_prefetch = 0 : i64, scratch_operands = 0 : i64, tpu.core_type = #tpu.core_type<tc>, window_params = [{transform_indices = @transform_0, window_bounds = array<i64: 2, 8, 32>}, {transform_indices = @transform_1, window_bounds = array<i64: 2, 8, 8>}, {transform_indices = @transform_2, window_bounds = array<i64: 2, 16, 32>}, {transform_indices = @transform_3, window_bounds = array<i64: 2, 1, 16>}, {pipeline_mode = #tpu.pipeline_mode<synchronous>, transform_indices = @transform_4, window_bounds = array<i64: 3, 32>}, {pipeline_mode = #tpu.pipeline_mode<synchronous>, transform_indices = @transform_5, window_bounds = array<i64: 3, 32>}, {pipeline_mode = #tpu.pipeline_mode<synchronous>, transform_indices = @transform_6, window_bounds = array<i64: 32, 96>}, {pipeline_mode = #tpu.pipeline_mode<synchronous>, transform_indices = @transform_7, window_bounds = array<i64: 1, 96>}, {pipeline_mode = #tpu.pipeline_mode<synchronous>, transform_indices = @transform_8, window_bounds = array<i64: 32, 32>}, {pipeline_mode = #tpu.pipeline_mode<synchronous>, transform_indices = @transform_9, window_bounds = array<i64: 1, 32>}, {pipeline_mode = #tpu.pipeline_mode<synchronous>, transform_indices = @transform_10, window_bounds = array<i64: 32, 32>}, {pipeline_mode = #tpu.pipeline_mode<synchronous>, transform_indices = @transform_11, window_bounds = array<i64: 1, 32>}, {pipeline_mode = #tpu.pipeline_mode<synchronous>, transform_indices = @transform_12, window_bounds = array<i64: 32, 64>}, {pipeline_mode = #tpu.pipeline_mode<synchronous>, transform_indices = @transform_13, window_bounds = array<i64: 1, 64>}, {pipeline_mode = #tpu.pipeline_mode<synchronous>, transform_indices = @transform_14, window_bounds = array<i64: 32, 32>}, {pipeline_mode = #tpu.pipeline_mode<synchronous>, transform_indices = @transform_15, window_bounds = array<i64: 1, 32>}, {pipeline_mode = #tpu.pipeline_mode<synchronous>, transform_indices = @transform_16, window_bounds = array<i64: 32, 64>}, {pipeline_mode = #tpu.pipeline_mode<synchronous>, transform_indices = @transform_17, window_bounds = array<i64: 1, 64>}, {pipeline_mode = #tpu.pipeline_mode<synchronous>, transform_indices = @transform_18, window_bounds = array<i64: 64, 32>}, {pipeline_mode = #tpu.pipeline_mode<synchronous>, transform_indices = @transform_19, window_bounds = array<i64: 1, 32>}, {transform_indices = @transform_20, window_bounds = array<i64: 2, 8, 32>}]} {
    %c0 = arith.constant 0 : index
    %c0_0 = arith.constant 0 : index
    %c0_1 = arith.constant 0 : index
    %0 = vector.load %arg1[%c0, %c0_0, %c0_1] : memref<2x8x32xf32, #tpu.memory_space<vmem>>, vector<2x8x32xf32>
    %1 = vector.shape_cast %0 : vector<2x8x32xf32> to vector<16x32xf32>
    %c0_2 = arith.constant 0 : index
    %c0_3 = arith.constant 0 : index
    %c0_4 = arith.constant 0 : index
    %2 = vector.load %arg3[%c0_2, %c0_3, %c0_4] : memref<2x16x32xf32, #tpu.memory_space<vmem>>, vector<2x16x32xf32>
    %3 = vector.shape_cast %2 : vector<2x16x32xf32> to vector<32x32xf32>
    %c0_5 = arith.constant 0 : index
    %c0_6 = arith.constant 0 : index
    %4 = vector.load %arg5[%c0_5, %c0_6] : memref<3x32xf32, #tpu.memory_space<vmem>>, vector<1x32xf32>
    %5 = vector.shape_cast %4 : vector<1x32xf32> to vector<32xf32>
    %c0_7 = arith.constant 0 : index
    %c0_8 = arith.constant 0 : index
    %6 = vector.load %arg6[%c0_7, %c0_8] : memref<3x32xf32, #tpu.memory_space<vmem>>, vector<1x32xf32>
    %7 = vector.shape_cast %6 : vector<1x32xf32> to vector<32xf32>
    %cst = arith.constant dense<0.000000e+00> : vector<16xf32>
    %8 = vector.multi_reduction <add>, %1, %cst [1] : vector<16x32xf32> to vector<16xf32>
    %9 = vector.shape_cast %8 : vector<16xf32> to vector<16x1xf32>
    %cst_9 = arith.constant 3.200000e+01 : f32
    %10 = vector.broadcast %cst_9 : f32 to vector<16x1xf32>
    %11 = arith.divf %9, %10 : vector<16x1xf32>
    %12 = vector.broadcast %11 : vector<16x1xf32> to vector<16x32xf32>
    %13 = arith.subf %1, %12 : vector<16x32xf32>
    %14 = arith.mulf %13, %13 : vector<16x32xf32>
    %cst_10 = arith.constant dense<0.000000e+00> : vector<16xf32>
    %15 = vector.multi_reduction <add>, %14, %cst_10 [1] : vector<16x32xf32> to vector<16xf32>
    %16 = vector.shape_cast %15 : vector<16xf32> to vector<16x1xf32>
    %cst_11 = arith.constant 3.200000e+01 : f32
    %17 = vector.broadcast %cst_11 : f32 to vector<16x1xf32>
    %18 = arith.divf %16, %17 : vector<16x1xf32>
    %19 = vector.broadcast %11 : vector<16x1xf32> to vector<16x32xf32>
    %20 = arith.subf %1, %19 : vector<16x32xf32>
    %cst_12 = arith.constant 9.99999996E-13 : f32
    %21 = vector.broadcast %cst_12 : f32 to vector<16x1xf32>
    %22 = arith.addf %18, %21 : vector<16x1xf32>
    %23 = math.rsqrt %22 : vector<16x1xf32>
    %24 = vector.broadcast %23 : vector<16x1xf32> to vector<16x32xf32>
    %25 = arith.mulf %20, %24 : vector<16x32xf32>
    %26 = vector.shape_cast %5 : vector<32xf32> to vector<1x32xf32>
    %27 = vector.broadcast %26 : vector<1x32xf32> to vector<16x32xf32>
    %28 = arith.mulf %25, %27 : vector<16x32xf32>
    %29 = vector.shape_cast %7 : vector<32xf32> to vector<1x32xf32>
    %30 = vector.broadcast %29 : vector<1x32xf32> to vector<16x32xf32>
    %31 = arith.addf %28, %30 : vector<16x32xf32>
    %c0_13 = arith.constant 0 : index
    %c0_14 = arith.constant 0 : index
    %32 = vector.load %arg7[%c0_13, %c0_14] : memref<32x96xf32, #tpu.memory_space<vmem>>, vector<32x96xf32>
    %cst_15 = arith.constant dense<0.000000e+00> : vector<16x96xf32>
    %33 = tpu.matmul %31, %32, %cst_15 {dimension_numbers = #tpu.dot_dimension_numbers<[1], [0], [0], [1], [0, 0, 1, 1], [], []>} : vector<16x32xf32>, vector<32x96xf32>, vector<16x96xf32> -> vector<16x96xf32>
    %c0_16 = arith.constant 0 : index
    %c0_17 = arith.constant 0 : index
    %34 = vector.load %arg8[%c0_16, %c0_17] : memref<1x96xf32, #tpu.memory_space<vmem>>, vector<1x96xf32>
    %35 = vector.broadcast %34 : vector<1x96xf32> to vector<16x96xf32>
    %36 = arith.addf %33, %35 : vector<16x96xf32>
    %c0_18 = arith.constant 0 : index
    %c0_19 = arith.constant 0 : index
    %c0_20 = arith.constant 0 : index
    %37 = vector.load %arg2[%c0_18, %c0_19, %c0_20] : memref<2x8x8xf32, #tpu.memory_space<vmem>>, vector<1x8x8xf32>
    %38 = vector.shape_cast %37 : vector<1x8x8xf32> to vector<8x8xf32>
    %c1 = arith.constant 1 : index
    %c0_21 = arith.constant 0 : index
    %c0_22 = arith.constant 0 : index
    %39 = vector.load %arg2[%c1, %c0_21, %c0_22] : memref<2x8x8xf32, #tpu.memory_space<vmem>>, vector<1x8x8xf32>
    %40 = vector.shape_cast %39 : vector<1x8x8xf32> to vector<8x8xf32>
    %41 = vector.extract_strided_slice %36 {offsets = [0, 0], sizes = [16, 32], strides = [1, 1]} : vector<16x96xf32> to vector<16x32xf32>
    %42 = vector.extract_strided_slice %36 {offsets = [0, 32], sizes = [16, 32], strides = [1, 1]} : vector<16x96xf32> to vector<16x32xf32>
    %43 = vector.extract_strided_slice %36 {offsets = [0, 64], sizes = [16, 32], strides = [1, 1]} : vector<16x96xf32> to vector<16x32xf32>
    %44 = vector.extract_strided_slice %41 {offsets = [0, 0], sizes = [8, 32], strides = [1, 1]} : vector<16x32xf32> to vector<8x32xf32>
    %45 = vector.extract_strided_slice %42 {offsets = [0, 0], sizes = [8, 32], strides = [1, 1]} : vector<16x32xf32> to vector<8x32xf32>
    %46 = vector.extract_strided_slice %44 {offsets = [0, 0], sizes = [8, 8], strides = [1, 1]} : vector<8x32xf32> to vector<8x8xf32>
    %47 = vector.extract_strided_slice %45 {offsets = [0, 0], sizes = [8, 8], strides = [1, 1]} : vector<8x32xf32> to vector<8x8xf32>
    %cst_23 = arith.constant dense<0.000000e+00> : vector<8x8xf32>
    %48 = tpu.matmul %46, %47, %cst_23 {dimension_numbers = #tpu.dot_dimension_numbers<[1], [1], [0], [0], [0, 0, 1, 0], [], []>} : vector<8x8xf32>, vector<8x8xf32>, vector<8x8xf32> -> vector<8x8xf32>
    %49 = vector.extract_strided_slice %44 {offsets = [0, 8], sizes = [8, 8], strides = [1, 1]} : vector<8x32xf32> to vector<8x8xf32>
    %50 = vector.extract_strided_slice %45 {offsets = [0, 8], sizes = [8, 8], strides = [1, 1]} : vector<8x32xf32> to vector<8x8xf32>
    %cst_24 = arith.constant dense<0.000000e+00> : vector<8x8xf32>
    %51 = tpu.matmul %49, %50, %cst_24 {dimension_numbers = #tpu.dot_dimension_numbers<[1], [1], [0], [0], [0, 0, 1, 0], [], []>} : vector<8x8xf32>, vector<8x8xf32>, vector<8x8xf32> -> vector<8x8xf32>
    %52 = vector.extract_strided_slice %44 {offsets = [0, 16], sizes = [8, 8], strides = [1, 1]} : vector<8x32xf32> to vector<8x8xf32>
    %53 = vector.extract_strided_slice %45 {offsets = [0, 16], sizes = [8, 8], strides = [1, 1]} : vector<8x32xf32> to vector<8x8xf32>
    %cst_25 = arith.constant dense<0.000000e+00> : vector<8x8xf32>
    %54 = tpu.matmul %52, %53, %cst_25 {dimension_numbers = #tpu.dot_dimension_numbers<[1], [1], [0], [0], [0, 0, 1, 0], [], []>} : vector<8x8xf32>, vector<8x8xf32>, vector<8x8xf32> -> vector<8x8xf32>
    %55 = vector.extract_strided_slice %44 {offsets = [0, 24], sizes = [8, 8], strides = [1, 1]} : vector<8x32xf32> to vector<8x8xf32>
    %56 = vector.extract_strided_slice %45 {offsets = [0, 24], sizes = [8, 8], strides = [1, 1]} : vector<8x32xf32> to vector<8x8xf32>
    %cst_26 = arith.constant dense<0.000000e+00> : vector<8x8xf32>
    %57 = tpu.matmul %55, %56, %cst_26 {dimension_numbers = #tpu.dot_dimension_numbers<[1], [1], [0], [0], [0, 0, 1, 0], [], []>} : vector<8x8xf32>, vector<8x8xf32>, vector<8x8xf32> -> vector<8x8xf32>
    %58 = vector.extract_strided_slice %41 {offsets = [8, 0], sizes = [8, 32], strides = [1, 1]} : vector<16x32xf32> to vector<8x32xf32>
    %59 = vector.extract_strided_slice %42 {offsets = [8, 0], sizes = [8, 32], strides = [1, 1]} : vector<16x32xf32> to vector<8x32xf32>
    %60 = vector.extract_strided_slice %58 {offsets = [0, 0], sizes = [8, 8], strides = [1, 1]} : vector<8x32xf32> to vector<8x8xf32>
    %61 = vector.extract_strided_slice %59 {offsets = [0, 0], sizes = [8, 8], strides = [1, 1]} : vector<8x32xf32> to vector<8x8xf32>
    %cst_27 = arith.constant dense<0.000000e+00> : vector<8x8xf32>
    %62 = tpu.matmul %60, %61, %cst_27 {dimension_numbers = #tpu.dot_dimension_numbers<[1], [1], [0], [0], [0, 0, 1, 0], [], []>} : vector<8x8xf32>, vector<8x8xf32>, vector<8x8xf32> -> vector<8x8xf32>
    %63 = vector.extract_strided_slice %58 {offsets = [0, 8], sizes = [8, 8], strides = [1, 1]} : vector<8x32xf32> to vector<8x8xf32>
    %64 = vector.extract_strided_slice %59 {offsets = [0, 8], sizes = [8, 8], strides = [1, 1]} : vector<8x32xf32> to vector<8x8xf32>
    %cst_28 = arith.constant dense<0.000000e+00> : vector<8x8xf32>
    %65 = tpu.matmul %63, %64, %cst_28 {dimension_numbers = #tpu.dot_dimension_numbers<[1], [1], [0], [0], [0, 0, 1, 0], [], []>} : vector<8x8xf32>, vector<8x8xf32>, vector<8x8xf32> -> vector<8x8xf32>
    %66 = vector.extract_strided_slice %58 {offsets = [0, 16], sizes = [8, 8], strides = [1, 1]} : vector<8x32xf32> to vector<8x8xf32>
    %67 = vector.extract_strided_slice %59 {offsets = [0, 16], sizes = [8, 8], strides = [1, 1]} : vector<8x32xf32> to vector<8x8xf32>
    %cst_29 = arith.constant dense<0.000000e+00> : vector<8x8xf32>
    %68 = tpu.matmul %66, %67, %cst_29 {dimension_numbers = #tpu.dot_dimension_numbers<[1], [1], [0], [0], [0, 0, 1, 0], [], []>} : vector<8x8xf32>, vector<8x8xf32>, vector<8x8xf32> -> vector<8x8xf32>
    %69 = vector.extract_strided_slice %58 {offsets = [0, 24], sizes = [8, 8], strides = [1, 1]} : vector<8x32xf32> to vector<8x8xf32>
    %70 = vector.extract_strided_slice %59 {offsets = [0, 24], sizes = [8, 8], strides = [1, 1]} : vector<8x32xf32> to vector<8x8xf32>
    %cst_30 = arith.constant dense<0.000000e+00> : vector<8x8xf32>
    %71 = tpu.matmul %69, %70, %cst_30 {dimension_numbers = #tpu.dot_dimension_numbers<[1], [1], [0], [0], [0, 0, 1, 0], [], []>} : vector<8x8xf32>, vector<8x8xf32>, vector<8x8xf32> -> vector<8x8xf32>
    %72 = tpu.concatenate %48, %51, %54, %57, %62, %65, %68, %71 in 0 : vector<8x8xf32>, vector<8x8xf32>, vector<8x8xf32>, vector<8x8xf32>, vector<8x8xf32>, vector<8x8xf32>, vector<8x8xf32>, vector<8x8xf32> -> vector<64x8xf32>
    %73 = tpu.concatenate %38, %38, %38, %38, %40, %40, %40, %40 in 0 : vector<8x8xf32>, vector<8x8xf32>, vector<8x8xf32>, vector<8x8xf32>, vector<8x8xf32>, vector<8x8xf32>, vector<8x8xf32>, vector<8x8xf32> -> vector<64x8xf32>
    %cst_31 = arith.constant 0.000000e+00 : f32
    %74 = vector.broadcast %cst_31 : f32 to vector<64x8xf32>
    %75 = arith.cmpf ogt, %73, %74 : vector<64x8xf32>
    %76 = arith.extui %75 : vector<64x8xi1> to vector<64x8xi32>
    %77 = arith.sitofp %76 : vector<64x8xi32> to vector<64x8xf32>
    %cst_32 = arith.constant 1.000000e+00 : f32
    %78 = vector.broadcast %cst_32 : f32 to vector<64x8xf32>
    %79 = arith.subf %77, %78 : vector<64x8xf32>
    %cst_33 = arith.constant 1.000000e+30 : f32
    %80 = vector.broadcast %cst_33 : f32 to vector<64x8xf32>
    %81 = arith.mulf %79, %80 : vector<64x8xf32>
    %82 = arith.addf %72, %81 : vector<64x8xf32>
    %cst_34 = arith.constant dense<0xFF800000> : vector<64xf32>
    %83 = vector.multi_reduction <maximumf>, %82, %cst_34 [1] : vector<64x8xf32> to vector<64xf32>
    %84 = vector.shape_cast %83 : vector<64xf32> to vector<64x1xf32>
    %85 = vector.broadcast %84 : vector<64x1xf32> to vector<64x8xf32>
    %86 = arith.subf %82, %85 : vector<64x8xf32>
    %87 = math.exp %86 : vector<64x8xf32>
    %cst_35 = arith.constant dense<0.000000e+00> : vector<64xf32>
    %88 = vector.multi_reduction <add>, %87, %cst_35 [1] : vector<64x8xf32> to vector<64xf32>
    %89 = vector.shape_cast %88 : vector<64xf32> to vector<64x1xf32>
    %90 = tpu.reciprocal %89 : vector<64x1xf32> -> vector<64x1xf32>
    %91 = vector.broadcast %90 : vector<64x1xf32> to vector<64x8xf32>
    %92 = arith.mulf %87, %91 : vector<64x8xf32>
    %93 = arith.mulf %92, %77 : vector<64x8xf32>
    %94 = vector.extract_strided_slice %43 {offsets = [0, 0], sizes = [8, 32], strides = [1, 1]} : vector<16x32xf32> to vector<8x32xf32>
    %95 = vector.extract_strided_slice %93 {offsets = [0, 0], sizes = [8, 8], strides = [1, 1]} : vector<64x8xf32> to vector<8x8xf32>
    %96 = vector.extract_strided_slice %94 {offsets = [0, 0], sizes = [8, 8], strides = [1, 1]} : vector<8x32xf32> to vector<8x8xf32>
    %cst_36 = arith.constant dense<0.000000e+00> : vector<8x8xf32>
    %97 = tpu.matmul %95, %96, %cst_36 {dimension_numbers = #tpu.dot_dimension_numbers<[1], [0], [0], [1], [0, 0, 1, 1], [], []>} : vector<8x8xf32>, vector<8x8xf32>, vector<8x8xf32> -> vector<8x8xf32>
    %98 = vector.extract_strided_slice %93 {offsets = [8, 0], sizes = [8, 8], strides = [1, 1]} : vector<64x8xf32> to vector<8x8xf32>
    %99 = vector.extract_strided_slice %94 {offsets = [0, 8], sizes = [8, 8], strides = [1, 1]} : vector<8x32xf32> to vector<8x8xf32>
    %cst_37 = arith.constant dense<0.000000e+00> : vector<8x8xf32>
    %100 = tpu.matmul %98, %99, %cst_37 {dimension_numbers = #tpu.dot_dimension_numbers<[1], [0], [0], [1], [0, 0, 1, 1], [], []>} : vector<8x8xf32>, vector<8x8xf32>, vector<8x8xf32> -> vector<8x8xf32>
    %101 = vector.extract_strided_slice %93 {offsets = [16, 0], sizes = [8, 8], strides = [1, 1]} : vector<64x8xf32> to vector<8x8xf32>
    %102 = vector.extract_strided_slice %94 {offsets = [0, 16], sizes = [8, 8], strides = [1, 1]} : vector<8x32xf32> to vector<8x8xf32>
    %cst_38 = arith.constant dense<0.000000e+00> : vector<8x8xf32>
    %103 = tpu.matmul %101, %102, %cst_38 {dimension_numbers = #tpu.dot_dimension_numbers<[1], [0], [0], [1], [0, 0, 1, 1], [], []>} : vector<8x8xf32>, vector<8x8xf32>, vector<8x8xf32> -> vector<8x8xf32>
    %104 = vector.extract_strided_slice %93 {offsets = [24, 0], sizes = [8, 8], strides = [1, 1]} : vector<64x8xf32> to vector<8x8xf32>
    %105 = vector.extract_strided_slice %94 {offsets = [0, 24], sizes = [8, 8], strides = [1, 1]} : vector<8x32xf32> to vector<8x8xf32>
    %cst_39 = arith.constant dense<0.000000e+00> : vector<8x8xf32>
    %106 = tpu.matmul %104, %105, %cst_39 {dimension_numbers = #tpu.dot_dimension_numbers<[1], [0], [0], [1], [0, 0, 1, 1], [], []>} : vector<8x8xf32>, vector<8x8xf32>, vector<8x8xf32> -> vector<8x8xf32>
    %107 = tpu.concatenate %97, %100, %103, %106 in 1 : vector<8x8xf32>, vector<8x8xf32>, vector<8x8xf32>, vector<8x8xf32> -> vector<8x32xf32>
    %108 = vector.extract_strided_slice %43 {offsets = [8, 0], sizes = [8, 32], strides = [1, 1]} : vector<16x32xf32> to vector<8x32xf32>
    %109 = vector.extract_strided_slice %93 {offsets = [32, 0], sizes = [8, 8], strides = [1, 1]} : vector<64x8xf32> to vector<8x8xf32>
    %110 = vector.extract_strided_slice %108 {offsets = [0, 0], sizes = [8, 8], strides = [1, 1]} : vector<8x32xf32> to vector<8x8xf32>
    %cst_40 = arith.constant dense<0.000000e+00> : vector<8x8xf32>
    %111 = tpu.matmul %109, %110, %cst_40 {dimension_numbers = #tpu.dot_dimension_numbers<[1], [0], [0], [1], [0, 0, 1, 1], [], []>} : vector<8x8xf32>, vector<8x8xf32>, vector<8x8xf32> -> vector<8x8xf32>
    %112 = vector.extract_strided_slice %93 {offsets = [40, 0], sizes = [8, 8], strides = [1, 1]} : vector<64x8xf32> to vector<8x8xf32>
    %113 = vector.extract_strided_slice %108 {offsets = [0, 8], sizes = [8, 8], strides = [1, 1]} : vector<8x32xf32> to vector<8x8xf32>
    %cst_41 = arith.constant dense<0.000000e+00> : vector<8x8xf32>
    %114 = tpu.matmul %112, %113, %cst_41 {dimension_numbers = #tpu.dot_dimension_numbers<[1], [0], [0], [1], [0, 0, 1, 1], [], []>} : vector<8x8xf32>, vector<8x8xf32>, vector<8x8xf32> -> vector<8x8xf32>
    %115 = vector.extract_strided_slice %93 {offsets = [48, 0], sizes = [8, 8], strides = [1, 1]} : vector<64x8xf32> to vector<8x8xf32>
    %116 = vector.extract_strided_slice %108 {offsets = [0, 16], sizes = [8, 8], strides = [1, 1]} : vector<8x32xf32> to vector<8x8xf32>
    %cst_42 = arith.constant dense<0.000000e+00> : vector<8x8xf32>
    %117 = tpu.matmul %115, %116, %cst_42 {dimension_numbers = #tpu.dot_dimension_numbers<[1], [0], [0], [1], [0, 0, 1, 1], [], []>} : vector<8x8xf32>, vector<8x8xf32>, vector<8x8xf32> -> vector<8x8xf32>
    %118 = vector.extract_strided_slice %93 {offsets = [56, 0], sizes = [8, 8], strides = [1, 1]} : vector<64x8xf32> to vector<8x8xf32>
    %119 = vector.extract_strided_slice %108 {offsets = [0, 24], sizes = [8, 8], strides = [1, 1]} : vector<8x32xf32> to vector<8x8xf32>
    %cst_43 = arith.constant dense<0.000000e+00> : vector<8x8xf32>
    %120 = tpu.matmul %118, %119, %cst_43 {dimension_numbers = #tpu.dot_dimension_numbers<[1], [0], [0], [1], [0, 0, 1, 1], [], []>} : vector<8x8xf32>, vector<8x8xf32>, vector<8x8xf32> -> vector<8x8xf32>
    %121 = tpu.concatenate %111, %114, %117, %120 in 1 : vector<8x8xf32>, vector<8x8xf32>, vector<8x8xf32>, vector<8x8xf32> -> vector<8x32xf32>
    %122 = tpu.concatenate %107, %121 in 0 : vector<8x32xf32>, vector<8x32xf32> -> vector<16x32xf32>
    %c0_44 = arith.constant 0 : index
    %c0_45 = arith.constant 0 : index
    %123 = vector.load %arg9[%c0_44, %c0_45] : memref<32x32xf32, #tpu.memory_space<vmem>>, vector<32x32xf32>
    %cst_46 = arith.constant dense<0.000000e+00> : vector<16x32xf32>
    %124 = tpu.matmul %122, %123, %cst_46 {dimension_numbers = #tpu.dot_dimension_numbers<[1], [0], [0], [1], [0, 0, 1, 1], [], []>} : vector<16x32xf32>, vector<32x32xf32>, vector<16x32xf32> -> vector<16x32xf32>
    %125 = arith.addf %1, %124 : vector<16x32xf32>
    %c0_47 = arith.constant 0 : index
    %c0_48 = arith.constant 0 : index
    %126 = vector.load %arg10[%c0_47, %c0_48] : memref<1x32xf32, #tpu.memory_space<vmem>>, vector<1x32xf32>
    %127 = vector.broadcast %126 : vector<1x32xf32> to vector<16x32xf32>
    %128 = arith.addf %125, %127 : vector<16x32xf32>
    %c1_49 = arith.constant 1 : index
    %c0_50 = arith.constant 0 : index
    %129 = vector.load %arg5[%c1_49, %c0_50] : memref<3x32xf32, #tpu.memory_space<vmem>>, vector<1x32xf32>
    %130 = vector.shape_cast %129 : vector<1x32xf32> to vector<32xf32>
    %c1_51 = arith.constant 1 : index
    %c0_52 = arith.constant 0 : index
    %131 = vector.load %arg6[%c1_51, %c0_52] : memref<3x32xf32, #tpu.memory_space<vmem>>, vector<1x32xf32>
    %132 = vector.shape_cast %131 : vector<1x32xf32> to vector<32xf32>
    %cst_53 = arith.constant dense<0.000000e+00> : vector<16xf32>
    %133 = vector.multi_reduction <add>, %128, %cst_53 [1] : vector<16x32xf32> to vector<16xf32>
    %134 = vector.shape_cast %133 : vector<16xf32> to vector<16x1xf32>
    %cst_54 = arith.constant 3.200000e+01 : f32
    %135 = vector.broadcast %cst_54 : f32 to vector<16x1xf32>
    %136 = arith.divf %134, %135 : vector<16x1xf32>
    %137 = vector.broadcast %136 : vector<16x1xf32> to vector<16x32xf32>
    %138 = arith.subf %128, %137 : vector<16x32xf32>
    %139 = arith.mulf %138, %138 : vector<16x32xf32>
    %cst_55 = arith.constant dense<0.000000e+00> : vector<16xf32>
    %140 = vector.multi_reduction <add>, %139, %cst_55 [1] : vector<16x32xf32> to vector<16xf32>
    %141 = vector.shape_cast %140 : vector<16xf32> to vector<16x1xf32>
    %cst_56 = arith.constant 3.200000e+01 : f32
    %142 = vector.broadcast %cst_56 : f32 to vector<16x1xf32>
    %143 = arith.divf %141, %142 : vector<16x1xf32>
    %144 = vector.broadcast %136 : vector<16x1xf32> to vector<16x32xf32>
    %145 = arith.subf %128, %144 : vector<16x32xf32>
    %cst_57 = arith.constant 9.99999996E-13 : f32
    %146 = vector.broadcast %cst_57 : f32 to vector<16x1xf32>
    %147 = arith.addf %143, %146 : vector<16x1xf32>
    %148 = math.rsqrt %147 : vector<16x1xf32>
    %149 = vector.broadcast %148 : vector<16x1xf32> to vector<16x32xf32>
    %150 = arith.mulf %145, %149 : vector<16x32xf32>
    %151 = vector.shape_cast %130 : vector<32xf32> to vector<1x32xf32>
    %152 = vector.broadcast %151 : vector<1x32xf32> to vector<16x32xf32>
    %153 = arith.mulf %150, %152 : vector<16x32xf32>
    %154 = vector.shape_cast %132 : vector<32xf32> to vector<1x32xf32>
    %155 = vector.broadcast %154 : vector<1x32xf32> to vector<16x32xf32>
    %156 = arith.addf %153, %155 : vector<16x32xf32>
    %c0_58 = arith.constant 0 : index
    %c0_59 = arith.constant 0 : index
    %157 = vector.load %arg11[%c0_58, %c0_59] : memref<32x32xf32, #tpu.memory_space<vmem>>, vector<32x32xf32>
    %cst_60 = arith.constant dense<0.000000e+00> : vector<16x32xf32>
    %158 = tpu.matmul %156, %157, %cst_60 {dimension_numbers = #tpu.dot_dimension_numbers<[1], [0], [0], [1], [0, 0, 1, 1], [], []>} : vector<16x32xf32>, vector<32x32xf32>, vector<16x32xf32> -> vector<16x32xf32>
    %c0_61 = arith.constant 0 : index
    %c0_62 = arith.constant 0 : index
    %159 = vector.load %arg12[%c0_61, %c0_62] : memref<1x32xf32, #tpu.memory_space<vmem>>, vector<1x32xf32>
    %160 = vector.broadcast %159 : vector<1x32xf32> to vector<16x32xf32>
    %161 = arith.addf %158, %160 : vector<16x32xf32>
    %c0_63 = arith.constant 0 : index
    %c0_64 = arith.constant 0 : index
    %162 = vector.load %arg13[%c0_63, %c0_64] : memref<32x64xf32, #tpu.memory_space<vmem>>, vector<32x64xf32>
    %cst_65 = arith.constant dense<0.000000e+00> : vector<32x64xf32>
    %163 = tpu.matmul %3, %162, %cst_65 {dimension_numbers = #tpu.dot_dimension_numbers<[1], [0], [0], [1], [0, 0, 1, 1], [], []>} : vector<32x32xf32>, vector<32x64xf32>, vector<32x64xf32> -> vector<32x64xf32>
    %c0_66 = arith.constant 0 : index
    %c0_67 = arith.constant 0 : index
    %164 = vector.load %arg14[%c0_66, %c0_67] : memref<1x64xf32, #tpu.memory_space<vmem>>, vector<1x64xf32>
    %165 = vector.broadcast %164 : vector<1x64xf32> to vector<32x64xf32>
    %166 = arith.addf %163, %165 : vector<32x64xf32>
    %c0_68 = arith.constant 0 : index
    %c0_69 = arith.constant 0 : index
    %c0_70 = arith.constant 0 : index
    %167 = vector.load %arg4[%c0_68, %c0_69, %c0_70] : memref<2x1x16xf32, #tpu.memory_space<vmem>>, vector<1x1x16xf32>
    %168 = vector.shape_cast %167 : vector<1x1x16xf32> to vector<1x16xf32>
    %169 = vector.shape_cast %168 : vector<1x16xf32> to vector<1x16xf32>
    %170 = vector.broadcast %169 : vector<1x16xf32> to vector<8x16xf32>
    %c1_71 = arith.constant 1 : index
    %c0_72 = arith.constant 0 : index
    %c0_73 = arith.constant 0 : index
    %171 = vector.load %arg4[%c1_71, %c0_72, %c0_73] : memref<2x1x16xf32, #tpu.memory_space<vmem>>, vector<1x1x16xf32>
    %172 = vector.shape_cast %171 : vector<1x1x16xf32> to vector<1x16xf32>
    %173 = vector.shape_cast %172 : vector<1x16xf32> to vector<1x16xf32>
    %174 = vector.broadcast %173 : vector<1x16xf32> to vector<8x16xf32>
    %175 = vector.extract_strided_slice %166 {offsets = [0, 0], sizes = [32, 32], strides = [1, 1]} : vector<32x64xf32> to vector<32x32xf32>
    %176 = vector.extract_strided_slice %166 {offsets = [0, 32], sizes = [32, 32], strides = [1, 1]} : vector<32x64xf32> to vector<32x32xf32>
    %177 = vector.extract_strided_slice %161 {offsets = [0, 0], sizes = [8, 32], strides = [1, 1]} : vector<16x32xf32> to vector<8x32xf32>
    %178 = vector.extract_strided_slice %175 {offsets = [0, 0], sizes = [16, 32], strides = [1, 1]} : vector<32x32xf32> to vector<16x32xf32>
    %179 = vector.extract_strided_slice %177 {offsets = [0, 0], sizes = [8, 8], strides = [1, 1]} : vector<8x32xf32> to vector<8x8xf32>
    %180 = vector.extract_strided_slice %178 {offsets = [0, 0], sizes = [16, 8], strides = [1, 1]} : vector<16x32xf32> to vector<16x8xf32>
    %cst_74 = arith.constant dense<0.000000e+00> : vector<8x16xf32>
    %181 = tpu.matmul %179, %180, %cst_74 {dimension_numbers = #tpu.dot_dimension_numbers<[1], [1], [0], [0], [0, 0, 1, 0], [], []>} : vector<8x8xf32>, vector<16x8xf32>, vector<8x16xf32> -> vector<8x16xf32>
    %182 = vector.extract_strided_slice %177 {offsets = [0, 8], sizes = [8, 8], strides = [1, 1]} : vector<8x32xf32> to vector<8x8xf32>
    %183 = vector.extract_strided_slice %178 {offsets = [0, 8], sizes = [16, 8], strides = [1, 1]} : vector<16x32xf32> to vector<16x8xf32>
    %cst_75 = arith.constant dense<0.000000e+00> : vector<8x16xf32>
    %184 = tpu.matmul %182, %183, %cst_75 {dimension_numbers = #tpu.dot_dimension_numbers<[1], [1], [0], [0], [0, 0, 1, 0], [], []>} : vector<8x8xf32>, vector<16x8xf32>, vector<8x16xf32> -> vector<8x16xf32>
    %185 = vector.extract_strided_slice %177 {offsets = [0, 16], sizes = [8, 8], strides = [1, 1]} : vector<8x32xf32> to vector<8x8xf32>
    %186 = vector.extract_strided_slice %178 {offsets = [0, 16], sizes = [16, 8], strides = [1, 1]} : vector<16x32xf32> to vector<16x8xf32>
    %cst_76 = arith.constant dense<0.000000e+00> : vector<8x16xf32>
    %187 = tpu.matmul %185, %186, %cst_76 {dimension_numbers = #tpu.dot_dimension_numbers<[1], [1], [0], [0], [0, 0, 1, 0], [], []>} : vector<8x8xf32>, vector<16x8xf32>, vector<8x16xf32> -> vector<8x16xf32>
    %188 = vector.extract_strided_slice %177 {offsets = [0, 24], sizes = [8, 8], strides = [1, 1]} : vector<8x32xf32> to vector<8x8xf32>
    %189 = vector.extract_strided_slice %178 {offsets = [0, 24], sizes = [16, 8], strides = [1, 1]} : vector<16x32xf32> to vector<16x8xf32>
    %cst_77 = arith.constant dense<0.000000e+00> : vector<8x16xf32>
    %190 = tpu.matmul %188, %189, %cst_77 {dimension_numbers = #tpu.dot_dimension_numbers<[1], [1], [0], [0], [0, 0, 1, 0], [], []>} : vector<8x8xf32>, vector<16x8xf32>, vector<8x16xf32> -> vector<8x16xf32>
    %191 = vector.extract_strided_slice %161 {offsets = [8, 0], sizes = [8, 32], strides = [1, 1]} : vector<16x32xf32> to vector<8x32xf32>
    %192 = vector.extract_strided_slice %175 {offsets = [16, 0], sizes = [16, 32], strides = [1, 1]} : vector<32x32xf32> to vector<16x32xf32>
    %193 = vector.extract_strided_slice %191 {offsets = [0, 0], sizes = [8, 8], strides = [1, 1]} : vector<8x32xf32> to vector<8x8xf32>
    %194 = vector.extract_strided_slice %192 {offsets = [0, 0], sizes = [16, 8], strides = [1, 1]} : vector<16x32xf32> to vector<16x8xf32>
    %cst_78 = arith.constant dense<0.000000e+00> : vector<8x16xf32>
    %195 = tpu.matmul %193, %194, %cst_78 {dimension_numbers = #tpu.dot_dimension_numbers<[1], [1], [0], [0], [0, 0, 1, 0], [], []>} : vector<8x8xf32>, vector<16x8xf32>, vector<8x16xf32> -> vector<8x16xf32>
    %196 = vector.extract_strided_slice %191 {offsets = [0, 8], sizes = [8, 8], strides = [1, 1]} : vector<8x32xf32> to vector<8x8xf32>
    %197 = vector.extract_strided_slice %192 {offsets = [0, 8], sizes = [16, 8], strides = [1, 1]} : vector<16x32xf32> to vector<16x8xf32>
    %cst_79 = arith.constant dense<0.000000e+00> : vector<8x16xf32>
    %198 = tpu.matmul %196, %197, %cst_79 {dimension_numbers = #tpu.dot_dimension_numbers<[1], [1], [0], [0], [0, 0, 1, 0], [], []>} : vector<8x8xf32>, vector<16x8xf32>, vector<8x16xf32> -> vector<8x16xf32>
    %199 = vector.extract_strided_slice %191 {offsets = [0, 16], sizes = [8, 8], strides = [1, 1]} : vector<8x32xf32> to vector<8x8xf32>
    %200 = vector.extract_strided_slice %192 {offsets = [0, 16], sizes = [16, 8], strides = [1, 1]} : vector<16x32xf32> to vector<16x8xf32>
    %cst_80 = arith.constant dense<0.000000e+00> : vector<8x16xf32>
    %201 = tpu.matmul %199, %200, %cst_80 {dimension_numbers = #tpu.dot_dimension_numbers<[1], [1], [0], [0], [0, 0, 1, 0], [], []>} : vector<8x8xf32>, vector<16x8xf32>, vector<8x16xf32> -> vector<8x16xf32>
    %202 = vector.extract_strided_slice %191 {offsets = [0, 24], sizes = [8, 8], strides = [1, 1]} : vector<8x32xf32> to vector<8x8xf32>
    %203 = vector.extract_strided_slice %192 {offsets = [0, 24], sizes = [16, 8], strides = [1, 1]} : vector<16x32xf32> to vector<16x8xf32>
    %cst_81 = arith.constant dense<0.000000e+00> : vector<8x16xf32>
    %204 = tpu.matmul %202, %203, %cst_81 {dimension_numbers = #tpu.dot_dimension_numbers<[1], [1], [0], [0], [0, 0, 1, 0], [], []>} : vector<8x8xf32>, vector<16x8xf32>, vector<8x16xf32> -> vector<8x16xf32>
    %205 = tpu.concatenate %181, %184, %187, %190, %195, %198, %201, %204 in 0 : vector<8x16xf32>, vector<8x16xf32>, vector<8x16xf32>, vector<8x16xf32>, vector<8x16xf32>, vector<8x16xf32>, vector<8x16xf32>, vector<8x16xf32> -> vector<64x16xf32>
    %206 = tpu.concatenate %170, %170, %170, %170, %174, %174, %174, %174 in 0 : vector<8x16xf32>, vector<8x16xf32>, vector<8x16xf32>, vector<8x16xf32>, vector<8x16xf32>, vector<8x16xf32>, vector<8x16xf32>, vector<8x16xf32> -> vector<64x16xf32>
    %cst_82 = arith.constant 0.000000e+00 : f32
    %207 = vector.broadcast %cst_82 : f32 to vector<64x16xf32>
    %208 = arith.cmpf ogt, %206, %207 : vector<64x16xf32>
    %209 = arith.extui %208 : vector<64x16xi1> to vector<64x16xi32>
    %210 = arith.sitofp %209 : vector<64x16xi32> to vector<64x16xf32>
    %cst_83 = arith.constant 1.000000e+00 : f32
    %211 = vector.broadcast %cst_83 : f32 to vector<64x16xf32>
    %212 = arith.subf %210, %211 : vector<64x16xf32>
    %cst_84 = arith.constant 1.000000e+30 : f32
    %213 = vector.broadcast %cst_84 : f32 to vector<64x16xf32>
    %214 = arith.mulf %212, %213 : vector<64x16xf32>
    %215 = arith.addf %205, %214 : vector<64x16xf32>
    %cst_85 = arith.constant dense<0xFF800000> : vector<64xf32>
    %216 = vector.multi_reduction <maximumf>, %215, %cst_85 [1] : vector<64x16xf32> to vector<64xf32>
    %217 = vector.shape_cast %216 : vector<64xf32> to vector<64x1xf32>
    %218 = vector.broadcast %217 : vector<64x1xf32> to vector<64x16xf32>
    %219 = arith.subf %215, %218 : vector<64x16xf32>
    %220 = math.exp %219 : vector<64x16xf32>
    %cst_86 = arith.constant dense<0.000000e+00> : vector<64xf32>
    %221 = vector.multi_reduction <add>, %220, %cst_86 [1] : vector<64x16xf32> to vector<64xf32>
    %222 = vector.shape_cast %221 : vector<64xf32> to vector<64x1xf32>
    %223 = tpu.reciprocal %222 : vector<64x1xf32> -> vector<64x1xf32>
    %224 = vector.broadcast %223 : vector<64x1xf32> to vector<64x16xf32>
    %225 = arith.mulf %220, %224 : vector<64x16xf32>
    %226 = arith.mulf %225, %210 : vector<64x16xf32>
    %227 = vector.extract_strided_slice %176 {offsets = [0, 0], sizes = [16, 32], strides = [1, 1]} : vector<32x32xf32> to vector<16x32xf32>
    %228 = vector.extract_strided_slice %226 {offsets = [0, 0], sizes = [8, 16], strides = [1, 1]} : vector<64x16xf32> to vector<8x16xf32>
    %229 = vector.extract_strided_slice %227 {offsets = [0, 0], sizes = [16, 8], strides = [1, 1]} : vector<16x32xf32> to vector<16x8xf32>
    %cst_87 = arith.constant dense<0.000000e+00> : vector<8x8xf32>
    %230 = tpu.matmul %228, %229, %cst_87 {dimension_numbers = #tpu.dot_dimension_numbers<[1], [0], [0], [1], [0, 0, 1, 1], [], []>} : vector<8x16xf32>, vector<16x8xf32>, vector<8x8xf32> -> vector<8x8xf32>
    %231 = vector.extract_strided_slice %226 {offsets = [8, 0], sizes = [8, 16], strides = [1, 1]} : vector<64x16xf32> to vector<8x16xf32>
    %232 = vector.extract_strided_slice %227 {offsets = [0, 8], sizes = [16, 8], strides = [1, 1]} : vector<16x32xf32> to vector<16x8xf32>
    %cst_88 = arith.constant dense<0.000000e+00> : vector<8x8xf32>
    %233 = tpu.matmul %231, %232, %cst_88 {dimension_numbers = #tpu.dot_dimension_numbers<[1], [0], [0], [1], [0, 0, 1, 1], [], []>} : vector<8x16xf32>, vector<16x8xf32>, vector<8x8xf32> -> vector<8x8xf32>
    %234 = vector.extract_strided_slice %226 {offsets = [16, 0], sizes = [8, 16], strides = [1, 1]} : vector<64x16xf32> to vector<8x16xf32>
    %235 = vector.extract_strided_slice %227 {offsets = [0, 16], sizes = [16, 8], strides = [1, 1]} : vector<16x32xf32> to vector<16x8xf32>
    %cst_89 = arith.constant dense<0.000000e+00> : vector<8x8xf32>
    %236 = tpu.matmul %234, %235, %cst_89 {dimension_numbers = #tpu.dot_dimension_numbers<[1], [0], [0], [1], [0, 0, 1, 1], [], []>} : vector<8x16xf32>, vector<16x8xf32>, vector<8x8xf32> -> vector<8x8xf32>
    %237 = vector.extract_strided_slice %226 {offsets = [24, 0], sizes = [8, 16], strides = [1, 1]} : vector<64x16xf32> to vector<8x16xf32>
    %238 = vector.extract_strided_slice %227 {offsets = [0, 24], sizes = [16, 8], strides = [1, 1]} : vector<16x32xf32> to vector<16x8xf32>
    %cst_90 = arith.constant dense<0.000000e+00> : vector<8x8xf32>
    %239 = tpu.matmul %237, %238, %cst_90 {dimension_numbers = #tpu.dot_dimension_numbers<[1], [0], [0], [1], [0, 0, 1, 1], [], []>} : vector<8x16xf32>, vector<16x8xf32>, vector<8x8xf32> -> vector<8x8xf32>
    %240 = tpu.concatenate %230, %233, %236, %239 in 1 : vector<8x8xf32>, vector<8x8xf32>, vector<8x8xf32>, vector<8x8xf32> -> vector<8x32xf32>
    %241 = vector.extract_strided_slice %176 {offsets = [16, 0], sizes = [16, 32], strides = [1, 1]} : vector<32x32xf32> to vector<16x32xf32>
    %242 = vector.extract_strided_slice %226 {offsets = [32, 0], sizes = [8, 16], strides = [1, 1]} : vector<64x16xf32> to vector<8x16xf32>
    %243 = vector.extract_strided_slice %241 {offsets = [0, 0], sizes = [16, 8], strides = [1, 1]} : vector<16x32xf32> to vector<16x8xf32>
    %cst_91 = arith.constant dense<0.000000e+00> : vector<8x8xf32>
    %244 = tpu.matmul %242, %243, %cst_91 {dimension_numbers = #tpu.dot_dimension_numbers<[1], [0], [0], [1], [0, 0, 1, 1], [], []>} : vector<8x16xf32>, vector<16x8xf32>, vector<8x8xf32> -> vector<8x8xf32>
    %245 = vector.extract_strided_slice %226 {offsets = [40, 0], sizes = [8, 16], strides = [1, 1]} : vector<64x16xf32> to vector<8x16xf32>
    %246 = vector.extract_strided_slice %241 {offsets = [0, 8], sizes = [16, 8], strides = [1, 1]} : vector<16x32xf32> to vector<16x8xf32>
    %cst_92 = arith.constant dense<0.000000e+00> : vector<8x8xf32>
    %247 = tpu.matmul %245, %246, %cst_92 {dimension_numbers = #tpu.dot_dimension_numbers<[1], [0], [0], [1], [0, 0, 1, 1], [], []>} : vector<8x16xf32>, vector<16x8xf32>, vector<8x8xf32> -> vector<8x8xf32>
    %248 = vector.extract_strided_slice %226 {offsets = [48, 0], sizes = [8, 16], strides = [1, 1]} : vector<64x16xf32> to vector<8x16xf32>
    %249 = vector.extract_strided_slice %241 {offsets = [0, 16], sizes = [16, 8], strides = [1, 1]} : vector<16x32xf32> to vector<16x8xf32>
    %cst_93 = arith.constant dense<0.000000e+00> : vector<8x8xf32>
    %250 = tpu.matmul %248, %249, %cst_93 {dimension_numbers = #tpu.dot_dimension_numbers<[1], [0], [0], [1], [0, 0, 1, 1], [], []>} : vector<8x16xf32>, vector<16x8xf32>, vector<8x8xf32> -> vector<8x8xf32>
    %251 = vector.extract_strided_slice %226 {offsets = [56, 0], sizes = [8, 16], strides = [1, 1]} : vector<64x16xf32> to vector<8x16xf32>
    %252 = vector.extract_strided_slice %241 {offsets = [0, 24], sizes = [16, 8], strides = [1, 1]} : vector<16x32xf32> to vector<16x8xf32>
    %cst_94 = arith.constant dense<0.000000e+00> : vector<8x8xf32>
    %253 = tpu.matmul %251, %252, %cst_94 {dimension_numbers = #tpu.dot_dimension_numbers<[1], [0], [0], [1], [0, 0, 1, 1], [], []>} : vector<8x16xf32>, vector<16x8xf32>, vector<8x8xf32> -> vector<8x8xf32>
    %254 = tpu.concatenate %244, %247, %250, %253 in 1 : vector<8x8xf32>, vector<8x8xf32>, vector<8x8xf32>, vector<8x8xf32> -> vector<8x32xf32>
    %255 = tpu.concatenate %240, %254 in 0 : vector<8x32xf32>, vector<8x32xf32> -> vector<16x32xf32>
    %c0_95 = arith.constant 0 : index
    %c0_96 = arith.constant 0 : index
    %256 = vector.load %arg15[%c0_95, %c0_96] : memref<32x32xf32, #tpu.memory_space<vmem>>, vector<32x32xf32>
    %cst_97 = arith.constant dense<0.000000e+00> : vector<16x32xf32>
    %257 = tpu.matmul %255, %256, %cst_97 {dimension_numbers = #tpu.dot_dimension_numbers<[1], [0], [0], [1], [0, 0, 1, 1], [], []>} : vector<16x32xf32>, vector<32x32xf32>, vector<16x32xf32> -> vector<16x32xf32>
    %258 = arith.addf %128, %257 : vector<16x32xf32>
    %c0_98 = arith.constant 0 : index
    %c0_99 = arith.constant 0 : index
    %259 = vector.load %arg16[%c0_98, %c0_99] : memref<1x32xf32, #tpu.memory_space<vmem>>, vector<1x32xf32>
    %260 = vector.broadcast %259 : vector<1x32xf32> to vector<16x32xf32>
    %261 = arith.addf %258, %260 : vector<16x32xf32>
    %c2 = arith.constant 2 : index
    %c0_100 = arith.constant 0 : index
    %262 = vector.load %arg5[%c2, %c0_100] : memref<3x32xf32, #tpu.memory_space<vmem>>, vector<1x32xf32>
    %263 = vector.shape_cast %262 : vector<1x32xf32> to vector<32xf32>
    %c2_101 = arith.constant 2 : index
    %c0_102 = arith.constant 0 : index
    %264 = vector.load %arg6[%c2_101, %c0_102] : memref<3x32xf32, #tpu.memory_space<vmem>>, vector<1x32xf32>
    %265 = vector.shape_cast %264 : vector<1x32xf32> to vector<32xf32>
    %cst_103 = arith.constant dense<0.000000e+00> : vector<16xf32>
    %266 = vector.multi_reduction <add>, %261, %cst_103 [1] : vector<16x32xf32> to vector<16xf32>
    %267 = vector.shape_cast %266 : vector<16xf32> to vector<16x1xf32>
    %cst_104 = arith.constant 3.200000e+01 : f32
    %268 = vector.broadcast %cst_104 : f32 to vector<16x1xf32>
    %269 = arith.divf %267, %268 : vector<16x1xf32>
    %270 = vector.broadcast %269 : vector<16x1xf32> to vector<16x32xf32>
    %271 = arith.subf %261, %270 : vector<16x32xf32>
    %272 = arith.mulf %271, %271 : vector<16x32xf32>
    %cst_105 = arith.constant dense<0.000000e+00> : vector<16xf32>
    %273 = vector.multi_reduction <add>, %272, %cst_105 [1] : vector<16x32xf32> to vector<16xf32>
    %274 = vector.shape_cast %273 : vector<16xf32> to vector<16x1xf32>
    %cst_106 = arith.constant 3.200000e+01 : f32
    %275 = vector.broadcast %cst_106 : f32 to vector<16x1xf32>
    %276 = arith.divf %274, %275 : vector<16x1xf32>
    %277 = vector.broadcast %269 : vector<16x1xf32> to vector<16x32xf32>
    %278 = arith.subf %261, %277 : vector<16x32xf32>
    %cst_107 = arith.constant 9.99999996E-13 : f32
    %279 = vector.broadcast %cst_107 : f32 to vector<16x1xf32>
    %280 = arith.addf %276, %279 : vector<16x1xf32>
    %281 = math.rsqrt %280 : vector<16x1xf32>
    %282 = vector.broadcast %281 : vector<16x1xf32> to vector<16x32xf32>
    %283 = arith.mulf %278, %282 : vector<16x32xf32>
    %284 = vector.shape_cast %263 : vector<32xf32> to vector<1x32xf32>
    %285 = vector.broadcast %284 : vector<1x32xf32> to vector<16x32xf32>
    %286 = arith.mulf %283, %285 : vector<16x32xf32>
    %287 = vector.shape_cast %265 : vector<32xf32> to vector<1x32xf32>
    %288 = vector.broadcast %287 : vector<1x32xf32> to vector<16x32xf32>
    %289 = arith.addf %286, %288 : vector<16x32xf32>
    %c0_108 = arith.constant 0 : index
    %c0_109 = arith.constant 0 : index
    %290 = vector.load %arg17[%c0_108, %c0_109] : memref<32x64xf32, #tpu.memory_space<vmem>>, vector<32x64xf32>
    %cst_110 = arith.constant dense<0.000000e+00> : vector<16x64xf32>
    %291 = tpu.matmul %289, %290, %cst_110 {dimension_numbers = #tpu.dot_dimension_numbers<[1], [0], [0], [1], [0, 0, 1, 1], [], []>} : vector<16x32xf32>, vector<32x64xf32>, vector<16x64xf32> -> vector<16x64xf32>
    %c0_111 = arith.constant 0 : index
    %c0_112 = arith.constant 0 : index
    %292 = vector.load %arg18[%c0_111, %c0_112] : memref<1x64xf32, #tpu.memory_space<vmem>>, vector<1x64xf32>
    %293 = vector.broadcast %292 : vector<1x64xf32> to vector<16x64xf32>
    %294 = arith.addf %291, %293 : vector<16x64xf32>
    %cst_113 = arith.constant 0.000000e+00 : f32
    %295 = vector.broadcast %cst_113 : f32 to vector<16x64xf32>
    %296 = arith.maximumf %294, %295 : vector<16x64xf32>
    %c0_114 = arith.constant 0 : index
    %c0_115 = arith.constant 0 : index
    %297 = vector.load %arg19[%c0_114, %c0_115] : memref<64x32xf32, #tpu.memory_space<vmem>>, vector<64x32xf32>
    %cst_116 = arith.constant dense<0.000000e+00> : vector<16x32xf32>
    %298 = tpu.matmul %296, %297, %cst_116 {dimension_numbers = #tpu.dot_dimension_numbers<[1], [0], [0], [1], [0, 0, 1, 1], [], []>} : vector<16x64xf32>, vector<64x32xf32>, vector<16x32xf32> -> vector<16x32xf32>
    %299 = arith.addf %261, %298 : vector<16x32xf32>
    %c0_117 = arith.constant 0 : index
    %c0_118 = arith.constant 0 : index
    %300 = vector.load %arg20[%c0_117, %c0_118] : memref<1x32xf32, #tpu.memory_space<vmem>>, vector<1x32xf32>
    %301 = vector.broadcast %300 : vector<1x32xf32> to vector<16x32xf32>
    %302 = arith.addf %299, %301 : vector<16x32xf32>
    %303 = vector.shape_cast %302 : vector<16x32xf32> to vector<2x8x32xf32>
    %c0_119 = arith.constant 0 : index
    %c0_120 = arith.constant 0 : index
    %c0_121 = arith.constant 0 : index
    %304 = vector.load %arg21[%c0_119, %c0_120, %c0_121] : memref<2x8x32xf32, #tpu.memory_space<vmem>>, vector<2x8x32xf32>
    tpu.vector_store %arg21[%c0_119, %c0_120, %c0_121], %303 {strides = array<i32>} : memref<2x8x32xf32, #tpu.memory_space<vmem>>, vector<2x8x32xf32>,
    return
  }
  func.func @transform_0(%arg0: i32) -> (i32, i32, i32) {
    %c0_i32 = arith.constant 0 : i32
    %c0_i32_0 = arith.constant 0 : i32
    %c0_i32_1 = arith.constant 0 : i32
    return %arg0, %c0_i32, %c0_i32_0 : i32, i32, i32
  }
  func.func @transform_1(%arg0: i32) -> (i32, i32, i32) {
    %c0_i32 = arith.constant 0 : i32
    %c0_i32_0 = arith.constant 0 : i32
    %c0_i32_1 = arith.constant 0 : i32
    return %arg0, %c0_i32, %c0_i32_0 : i32, i32, i32
  }
  func.func @transform_2(%arg0: i32) -> (i32, i32, i32) {
    %c0_i32 = arith.constant 0 : i32
    %c0_i32_0 = arith.constant 0 : i32
    %c0_i32_1 = arith.constant 0 : i32
    return %arg0, %c0_i32, %c0_i32_0 : i32, i32, i32
  }
  func.func @transform_3(%arg0: i32) -> (i32, i32, i32) {
    %c0_i32 = arith.constant 0 : i32
    %c0_i32_0 = arith.constant 0 : i32
    %c0_i32_1 = arith.constant 0 : i32
    return %arg0, %c0_i32, %c0_i32_0 : i32, i32, i32
  }
  func.func @transform_4(%arg0: i32) -> (i32, i32) {
    %c0_i32 = arith.constant 0 : i32
    %c0_i32_0 = arith.constant 0 : i32
    %c0_i32_1 = arith.constant 0 : i32
    return %c0_i32, %c0_i32_0 : i32, i32
  }
  func.func @transform_5(%arg0: i32) -> (i32, i32) {
    %c0_i32 = arith.constant 0 : i32
    %c0_i32_0 = arith.constant 0 : i32
    %c0_i32_1 = arith.constant 0 : i32
    return %c0_i32, %c0_i32_0 : i32, i32
  }
  func.func @transform_6(%arg0: i32) -> (i32, i32) {
    %c0_i32 = arith.constant 0 : i32
    %c0_i32_0 = arith.constant 0 : i32
    %c0_i32_1 = arith.constant 0 : i32
    return %c0_i32, %c0_i32_0 : i32, i32
  }
  func.func @transform_7(%arg0: i32) -> (i32, i32) {
    %c0_i32 = arith.constant 0 : i32
    %c0_i32_0 = arith.constant 0 : i32
    %c0_i32_1 = arith.constant 0 : i32
    return %c0_i32, %c0_i32_0 : i32, i32
  }
  func.func @transform_8(%arg0: i32) -> (i32, i32) {
    %c0_i32 = arith.constant 0 : i32
    %c0_i32_0 = arith.constant 0 : i32
    %c0_i32_1 = arith.constant 0 : i32
    return %c0_i32, %c0_i32_0 : i32, i32
  }
  func.func @transform_9(%arg0: i32) -> (i32, i32) {
    %c0_i32 = arith.constant 0 : i32
    %c0_i32_0 = arith.constant 0 : i32
    %c0_i32_1 = arith.constant 0 : i32
    return %c0_i32, %c0_i32_0 : i32, i32
  }
  func.func @transform_10(%arg0: i32) -> (i32, i32) {
    %c0_i32 = arith.constant 0 : i32
    %c0_i32_0 = arith.constant 0 : i32
    %c0_i32_1 = arith.constant 0 : i32
    return %c0_i32, %c0_i32_0 : i32, i32
  }
  func.func @transform_11(%arg0: i32) -> (i32, i32) {
    %c0_i32 = arith.constant 0 : i32
    %c0_i32_0 = arith.constant 0 : i32
    %c0_i32_1 = arith.constant 0 : i32
    return %c0_i32, %c0_i32_0 : i32, i32
  }
  func.func @transform_12(%arg0: i32) -> (i32, i32) {
    %c0_i32 = arith.constant 0 : i32
    %c0_i32_0 = arith.constant 0 : i32
    %c0_i32_1 = arith.constant 0 : i32
    return %c0_i32, %c0_i32_0 : i32, i32
  }
  func.func @transform_13(%arg0: i32) -> (i32, i32) {
    %c0_i32 = arith.constant 0 : i32
    %c0_i32_0 = arith.constant 0 : i32
    %c0_i32_1 = arith.constant 0 : i32
    return %c0_i32, %c0_i32_0 : i32, i32
  }
  func.func @transform_14(%arg0: i32) -> (i32, i32) {
    %c0_i32 = arith.constant 0 : i32
    %c0_i32_0 = arith.constant 0 : i32
    %c0_i32_1 = arith.constant 0 : i32
    return %c0_i32, %c0_i32_0 : i32, i32
  }
  func.func @transform_15(%arg0: i32) -> (i32, i32) {
    %c0_i32 = arith.constant 0 : i32
    %c0_i32_0 = arith.constant 0 : i32
    %c0_i32_1 = arith.constant 0 : i32
    return %c0_i32, %c0_i32_0 : i32, i32
  }
  func.func @transform_16(%arg0: i32) -> (i32, i32) {
    %c0_i32 = arith.constant 0 : i32
    %c0_i32_0 = arith.constant 0 : i32
    %c0_i32_1 = arith.constant 0 : i32
    return %c0_i32, %c0_i32_0 : i32, i32
  }
  func.func @transform_17(%arg0: i32) -> (i32, i32) {
    %c0_i32 = arith.constant 0 : i32
    %c0_i32_0 = arith.constant 0 : i32
    %c0_i32_1 = arith.constant 0 : i32
    return %c0_i32, %c0_i32_0 : i32, i32
  }
  func.func @transform_18(%arg0: i32) -> (i32, i32) {
    %c0_i32 = arith.constant 0 : i32
    %c0_i32_0 = arith.constant 0 : i32
    %c0_i32_1 = arith.constant 0 : i32
    return %c0_i32, %c0_i32_0 : i32, i32
  }
  func.func @transform_19(%arg0: i32) -> (i32, i32) {
    %c0_i32 = arith.constant 0 : i32
    %c0_i32_0 = arith.constant 0 : i32
    %c0_i32_1 = arith.constant 0 : i32
    return %c0_i32, %c0_i32_0 : i32, i32
  }
  func.func @transform_20(%arg0: i32) -> (i32, i32, i32) {
    %c0_i32 = arith.constant 0 : i32
    %c0_i32_0 = arith.constant 0 : i32
    %c0_i32_1 = arith.constant 0 : i32
    return %arg0, %c0_i32, %c0_i32_0 : i32, i32, i32
  }
}

</mosaic_0001>

<bundles_post_ra>
// kernel: tpu_custom_call.1
= control target key start
LH: loop header
LB: loop body
LE: loop exit
PB: predicated region body
PF: predicated region fallthrough
CT: control target
= control target key end

     0   :  { %s5617_s0 = inlined_call_operand.hbm [shape: f32[2,8,32], index: 0, kind: input, shape index: {}]   ;;  %s5618_s1 = inlined_call_operand.hbm [shape: f32[2,8,8], index: 1, kind: input, shape index: {}]   ;;  %s5619_s2 = inlined_call_operand.vmem [shape: f32[2,16,32], index: 2, kind: input, shape index: {}]   ;;  %s5620_s3 = inlined_call_operand.hbm [shape: f32[2,1,16], index: 3, kind: input, shape index: {}]   ;;  %s5621_s4 = inlined_call_operand.hbm [shape: f32[3,32], index: 4, kind: input, shape index: {}]   ;;  %s5622_s5 = inlined_call_operand.hbm [shape: f32[3,32], index: 5, kind: input, shape index: {}]   ;;  %s5623_s6 = inlined_call_operand.vmem [shape: f32[32,96], index: 6, kind: input, shape index: {}]   ;;  %s5624_s7 = inlined_call_operand.hbm [shape: f32[1,96], index: 7, kind: input, shape index: {}]   ;;  %s5625_s8 = inlined_call_operand.vmem [shape: f32[32,32], index: 8, kind: input, shape index: {}]   ;;  %s5626_s9 = inlined_call_operand.hbm [shape: f32[1,32], index: 9, kind: input, shape index: {}]   ;;  %s5627_s10 = inlined_call_operand.hbm [shape: f32[32,32], index: 10, kind: input, shape index: {}]   ;;  %s5628_s11 = inlined_call_operand.hbm [shape: f32[1,32], index: 11, kind: input, shape index: {}]   ;;  %s5629_s12 = inlined_call_operand.hbm [shape: f32[32,64], index: 12, kind: input, shape index: {}]   ;;  %s5630_s13 = inlined_call_operand.hbm [shape: f32[1,64], index: 13, kind: input, shape index: {}]   ;;  %s5631_s14 = inlined_call_operand.hbm [shape: f32[32,32], index: 14, kind: input, shape index: {}]   ;;  %s5632_s15 = inlined_call_operand.hbm [shape: f32[1,32], index: 15, kind: input, shape index: {}]   ;;  %s5633_s16 = inlined_call_operand.hbm [shape: f32[32,64], index: 16, kind: input, shape index: {}]   ;;  %s5634_s17 = inlined_call_operand.hbm [shape: f32[1,64], index: 17, kind: input, shape index: {}]   ;;  %s5635_s18 = inlined_call_operand.vmem [shape: f32[64,32], index: 18, kind: input, shape index: {}]   ;;  %s5636_s19 = inlined_call_operand.vmem [shape: f32[1,32], index: 19, kind: input, shape index: {}]   ;;  %s5637_s20 = inlined_call_operand.hbm [shape: f32[2,8,32], index: 20, kind: output, shape index: {}]  }
   0x1   :  { %5639 = sst [smem:[#allocation36_spill]] %s5617_s0 }
   0x2   :  { %5640 = sst [smem:[#allocation37_spill]] %s5618_s1 }
   0x3   :  { %5641 = sst [smem:[#allocation38_spill]] %s5619_s2 }
   0x4   :  { %5642 = sst [smem:[#allocation39_spill]] %s5620_s3 }
   0x5   :  { %5643 = sst [smem:[#allocation40_spill]] %s5621_s4 }
   0x6   :  { %5644 = sst [smem:[#allocation41_spill]] %s5637_s20 }
   0x7   :  { %25 = vsyncpa [#allocation3], 0 }
   0x8   :  { %26 = vsyncpa [#allocation6], 0 }
   0x9   :  { %27 = vsyncpa [#allocation9], 0 }
   0xa   :  { %28 = vsyncpa [#allocation12], 0 }
   0xb   :  { %29 = vsyncpa [#allocation15], 0 }
   0xc   :  { %30 = vsyncpa [#allocation18], 0 }
   0xd   :  { %31 = vsyncpa [#allocation21], 0 }
   0xe   :  { %32 = vsyncpa [#allocation24], 0 }
   0xf   :  { %33 = vsyncpa [#allocation4], 0  ;;  %s4858_s1 = smov [#allocation5]   ;;  %s4859_s23 = smov [#allocation8]  }
  0x10   :  { %s51_s22 = sshll.u32 %s4858_s1, 4  ;;  %s78_s24 = sshll.u32 %s4859_s23, 4  ;;  %s52_s22 = int_to_ptr.vmem [resolvable:$true] %s51_s22  ;;  %s79_s24 = int_to_ptr.vmem [resolvable:$true] %s78_s24 }
  0x11   :  { %s4528_s2 = scalar_lea.vmem %s52_s22, 256  ;;  %p4533_p1 = scmp.lt.s32.totalorder %s52_s22, %s52_s22 }
  0x12   :  { %p4529_p0 = scmp.ne.s32.totalorder %s52_s22, %s4528_s2  ;;  %p4534_p2 = scmp.lt.s32.totalorder %s4528_s2, %s4528_s2 }
  0x14   :  { %p4535_p3 = por %p4534_p2, %p4533_p1 }
  0x16   :  { %p4536_p4 = pnand %p4535_p3, %p4529_p0 }
  0x18   :  { %4539 = shalt.err (!%p4536_p4)
}
  0x19   :  { %s4860_s25 = smov 128   ;;  %s4861_s3 = smov 8  }
  0x1a   :  { %s5645_s28 = sld [smem:[#allocation37_spill]]  ;;  %s4548_s4 = scalar_lea.vmem %s79_s24, 64 }
  0x1b   :  { %p4549_p5 = scmp.ne.s32.totalorder %s79_s24, %s4548_s4  ;;  %p4553_p6 = scmp.lt.s32.totalorder %s79_s24, %s79_s24 }
  0x1c   :  { %p4554_p7 = scmp.lt.s32.totalorder %s4548_s4, %s4548_s4 }
  0x1e   :  { %p4555_p8 = por %p4554_p7, %p4553_p6 }
  0x20   :  { %57 = dma.hbm_to_vmem [thread:$0]  %s5645_s28, 256, %s52_s22, [#allocation6], %s4860_s25, %s4860_s25, %s4861_s3  }
  0x21   :  { %p4556_p9 = pnand %p4555_p8, %p4549_p5 }
  0x23   :  { %4559 = shalt.err (!%p4556_p9)
}
  0x24   :  { %s5646_s0 = sld [smem:[#allocation40_spill]]  ;;  %s4862_s21 = smov [#allocation11]  }
  0x25   :  { %s100_s1 = sshll.u32 %s4862_s21, 4  ;;  %s4863_s23 = smov [#allocation14]   ;;  %s101_s1 = int_to_ptr.vmem [resolvable:$true] %s100_s1 }
  0x26   :  { %s121_s2 = sshll.u32 %s4863_s23, 4  ;;  %s4568_s20 = scalar_lea.vmem %s101_s1, 16  ;;  %s122_s2 = int_to_ptr.vmem [resolvable:$true] %s121_s2 }
  0x27   :  { %p4569_p10 = scmp.ne.s32.totalorder %s101_s1, %s4568_s20  ;;  %s4572_s22 = scalar_lea.vmem %s101_s1, 32 }
  0x28   :  { %p4573_p11 = scmp.lt.s32.totalorder %s101_s1, %s101_s1  ;;  %p4574_p12 = scmp.lt.s32.totalorder %s4572_s22, %s4568_s20 }
  0x2a   :  { %81 = dma.hbm_to_vmem [thread:$0]  %s5646_s0, 64, %s79_s24, [#allocation9]  }
  0x2b   :  { %p4575_p13 = por %p4574_p12, %p4573_p11 }
  0x2d   :  { %p4576_p0 = pnand %p4575_p13, %p4569_p10 }
  0x2f   :  { %4579 = shalt.err (!%p4576_p0)
}
  0x30   :  { %103 = dma.hbm_to_vmem [thread:$0]  %s5624_s7, 16, %s101_s1, [#allocation12]  }
  0x31   :  { %s4588_s28 = scalar_lea.vmem %s122_s2, 512  ;;  %p4593_p2 = scmp.lt.s32.totalorder %s122_s2, %s122_s2 }
  0x32   :  { %p4589_p1 = scmp.ne.s32.totalorder %s122_s2, %s4588_s28  ;;  %p4594_p3 = scmp.lt.s32.totalorder %s4588_s28, %s4588_s28 }
  0x34   :  { %p4595_p4 = por %p4594_p3, %p4593_p2 }
  0x36   :  { %p4596_p5 = pnand %p4595_p4, %p4589_p1 }
  0x38   :  { %4599 = shalt.err (!%p4596_p5)
}
  0x39   :  { %127 = dma.hbm_to_vmem [thread:$0]  %s5627_s10, 512, %s122_s2, [#allocation15], %s4860_s25, %s4860_s25, %s4861_s3  }
  0x3a   :  { %s4864_s20 = smov [#allocation17]   ;;  %s4865_s30 = smov [#allocation20]  }
  0x3b   :  { %s143_s29 = sshll.u32 %s4864_s20, 4  ;;  %s165_s0 = sshll.u32 %s4865_s30, 4  ;;  %s144_s29 = int_to_ptr.vmem [resolvable:$true] %s143_s29  ;;  %s166_s0 = int_to_ptr.vmem [resolvable:$true] %s165_s0 }
  0x3c   :  { %s4608_s7 = scalar_lea.vmem %s144_s29, 512  ;;  %p4613_p7 = scmp.lt.s32.totalorder %s144_s29, %s144_s29 }
  0x3d   :  { %p4609_p6 = scmp.ne.s32.totalorder %s144_s29, %s4608_s7  ;;  %p4614_p8 = scmp.lt.s32.totalorder %s4608_s7, %s4608_s7 }
  0x3f   :  { %p4615_p9 = por %p4614_p8, %p4613_p7 }
  0x41   :  { %p4616_p10 = pnand %p4615_p9, %p4609_p6 }
  0x43   :  { %4619 = shalt.err (!%p4616_p10)
}
  0x44   :  { %149 = dma.hbm_to_vmem [thread:$0]  %s5629_s12, 512, %s144_s29, [#allocation18], %s4860_s25, %s4860_s25, %s4861_s3  }
  0x45   :  { %s4628_s10 = scalar_lea.vmem %s166_s0, 512  ;;  %p4633_p12 = scmp.lt.s32.totalorder %s166_s0, %s166_s0 }
  0x46   :  { %p4629_p11 = scmp.ne.s32.totalorder %s166_s0, %s4628_s10  ;;  %p4634_p13 = scmp.lt.s32.totalorder %s4628_s10, %s4628_s10 }
  0x48   :  { %p4635_p0 = por %p4634_p13, %p4633_p12 }
  0x4a   :  { %p4636_p1 = pnand %p4635_p0, %p4629_p11 }
  0x4c   :  { %4639 = shalt.err (!%p4636_p1)
}
  0x4d   :  { %171 = dma.hbm_to_vmem [thread:$0]  %s5631_s14, 512, %s166_s0, [#allocation21], %s4860_s25, %s4860_s25, %s4861_s3  }
  0x4e   :  { %s4866_s22 = smov [#allocation23]   ;;  %s4867_s27 = smov [#allocation2]  }
  0x4f   :  { %s187_s26 = sshll.u32 %s4866_s22, 4  ;;  %s39_s28 = sshll.u32 %s4867_s27, 4  ;;  %s188_s26 = int_to_ptr.vmem [resolvable:$true] %s187_s26  ;;  %s40_s28 = int_to_ptr.vmem [resolvable:$true] %s39_s28 }
  0x50   :  { %s4648_s12 = scalar_lea.vmem %s188_s26, 512  ;;  %p4653_p3 = scmp.lt.s32.totalorder %s188_s26, %s188_s26 }
  0x51   :  { %p4649_p2 = scmp.ne.s32.totalorder %s188_s26, %s4648_s12  ;;  %p4654_p4 = scmp.lt.s32.totalorder %s4648_s12, %s4648_s12 }
  0x53   :  { %p4655_p5 = por %p4654_p4, %p4653_p3 }
  0x55   :  { %p4656_p6 = pnand %p4655_p5, %p4649_p2 }
  0x57   :  { %4659 = shalt.err (!%p4656_p6)
}
  0x58   :  { %193 = dma.hbm_to_vmem [thread:$0]  %s5633_s16, 512, %s188_s26, [#allocation24], %s4860_s25, %s4860_s25, %s4861_s3  }
  0x59   :  { %s4668_s14 = scalar_lea.vmem %s40_s28, 256  ;;  %p4673_p8 = scmp.lt.s32.totalorder %s40_s28, %s40_s28 }
  0x5a   :  { %p4669_p7 = scmp.ne.s32.totalorder %s40_s28, %s4668_s14  ;;  %p4674_p9 = scmp.lt.s32.totalorder %s4668_s14, %s4668_s14 }
  0x5c   :  { %p4675_p10 = por %p4674_p9, %p4673_p8 }
  0x5e   :  { %p4676_p11 = pnand %p4675_p10, %p4669_p7 }
  0x60   :  { %4679 = shalt.err (!%p4676_p11)
}
  0x61   :  { %s5647_s30 = sld [smem:[#allocation36_spill]]  ;;  %s4868_s0 = smov [#allocation7]  }
  0x62   :  { %s65_s7 = sshll.u32 %s4868_s0, 4  ;;  %s66_s7 = int_to_ptr.vmem [resolvable:$true] %s65_s7 }
  0x63   :  { %s4688_s21 = scalar_lea.vmem %s66_s7, 32  ;;  %p4693_p13 = scmp.lt.s32.totalorder %s66_s7, %s66_s7 }
  0x64   :  { %p4689_p12 = scmp.ne.s32.totalorder %s66_s7, %s4688_s21  ;;  %p4694_p0 = scmp.lt.s32.totalorder %s4688_s21, %s4688_s21 }
  0x66   :  { %p4695_p1 = por %p4694_p0, %p4693_p13 }
  0x67   :  { %45 = dma.hbm_to_vmem [thread:$0]  %s5647_s30, 256, %s40_s28, [#allocation3], %s4860_s25, %s4860_s25, %s4861_s3  }
  0x68   :  { %p4696_p2 = pnand %p4695_p1, %p4689_p12 }
  0x6a   :  { %4699 = shalt.err (!%p4696_p2)
}
  0x6b   :  { %s4869_s16 = smov 16   ;;  %s4870_s1 = smov 1  }
  0x6c   :  { %s5648_s2 = sld [smem:[#allocation39_spill]]  ;;  %s4871_s22 = smov [#allocation10]  }
  0x6d   :  { %s88_s26 = sshll.u32 %s4871_s22, 4  ;;  %s4872_s27 = smov [#allocation13]   ;;  %s89_s26 = int_to_ptr.vmem [resolvable:$true] %s88_s26 }
  0x6e   :  { %s112_s28 = sshll.u32 %s4872_s27, 4  ;;  %s4708_s12 = scalar_lea.vmem %s89_s26, 64  ;;  %s113_s28 = int_to_ptr.vmem [resolvable:$true] %s112_s28 }
  0x6f   :  { %p4709_p3 = scmp.ne.s32.totalorder %s89_s26, %s4708_s12  ;;  %p4713_p4 = scmp.lt.s32.totalorder %s89_s26, %s89_s26 }
  0x70   :  { %p4714_p5 = scmp.lt.s32.totalorder %s4708_s12, %s4708_s12 }
  0x72   :  { %71 = dma.hbm_to_vmem [thread:$0]  %s5648_s2, 32, %s66_s7, [#allocation6], %s4869_s16, %s4869_s16, %s4870_s1  }
  0x73   :  { %p4715_p6 = por %p4714_p5, %p4713_p4 }
  0x75   :  { %p4716_p7 = pnand %p4715_p6, %p4709_p3 }
  0x77   :  { %4719 = shalt.err (!%p4716_p7)
}
  0x78   :  { %91 = dma.hbm_to_vmem [thread:$0]  %s5622_s5, 64, %s89_s26, [#allocation9]  }
  0x79   :  { %s4728_s14 = scalar_lea.vmem %s113_s28, 16  ;;  %s4732_s20 = scalar_lea.vmem %s113_s28, 32 }
  0x7a   :  { %p4729_p8 = scmp.ne.s32.totalorder %s113_s28, %s4728_s14  ;;  %p4733_p9 = scmp.lt.s32.totalorder %s113_s28, %s113_s28 }
  0x7b   :  { %p4734_p10 = scmp.lt.s32.totalorder %s4732_s20, %s4728_s14 }
  0x7d   :  { %p4735_p11 = por %p4734_p10, %p4733_p9 }
  0x7f   :  { %p4736_p12 = pnand %p4735_p11, %p4729_p8 }
  0x81   :  { %4739 = shalt.err (!%p4736_p12)
}
  0x82   :  { %115 = dma.hbm_to_vmem [thread:$0]  %s5626_s9, 16, %s113_s28, [#allocation12]  }
  0x83   :  { %s4873_s0 = smov [#allocation16]   ;;  %s4874_s21 = smov [#allocation19]  }
  0x84   :  { %s134_s7 = sshll.u32 %s4873_s0, 4  ;;  %s156_s1 = sshll.u32 %s4874_s21, 4  ;;  %s135_s7 = int_to_ptr.vmem [resolvable:$true] %s134_s7  ;;  %s157_s1 = int_to_ptr.vmem [resolvable:$true] %s156_s1 }
  0x85   :  { %s4748_s10 = scalar_lea.vmem %s135_s7, 16  ;;  %s4752_s5 = scalar_lea.vmem %s135_s7, 32 }
  0x86   :  { %p4749_p13 = scmp.ne.s32.totalorder %s135_s7, %s4748_s10  ;;  %p4753_p0 = scmp.lt.s32.totalorder %s135_s7, %s135_s7 }
  0x87   :  { %p4754_p1 = scmp.lt.s32.totalorder %s4752_s5, %s4748_s10 }
  0x89   :  { %p4755_p2 = por %p4754_p1, %p4753_p0 }
  0x8b   :  { %p4756_p3 = pnand %p4755_p2, %p4749_p13 }
  0x8d   :  { %4759 = shalt.err (!%p4756_p3)
}
  0x8e   :  { %137 = dma.hbm_to_vmem [thread:$0]  %s5628_s11, 16, %s135_s7, [#allocation15]  }
  0x8f   :  { %s4768_s22 = scalar_lea.vmem %s157_s1, 16  ;;  %s4772_s9 = scalar_lea.vmem %s157_s1, 32 }
  0x90   :  { %p4769_p4 = scmp.ne.s32.totalorder %s157_s1, %s4768_s22  ;;  %p4773_p5 = scmp.lt.s32.totalorder %s157_s1, %s157_s1 }
  0x91   :  { %p4774_p6 = scmp.lt.s32.totalorder %s4772_s9, %s4768_s22 }
  0x93   :  { %p4775_p7 = por %p4774_p6, %p4773_p5 }
  0x95   :  { %p4776_p8 = pnand %p4775_p7, %p4769_p4 }
  0x97   :  { %4779 = shalt.err (!%p4776_p8)
}
  0x98   :  { %159 = dma.hbm_to_vmem [thread:$0]  %s5630_s13, 16, %s157_s1, [#allocation18]  }
  0x99   :  { %s4875_s28 = smov [#allocation22]   ;;  %s4876_s24 = smov [#allocation25]  }
  0x9a   :  { %s178_s12 = sshll.u32 %s4875_s28, 4  ;;  %s200_s4 = sshll.u32 %s4876_s24, 4  ;;  %s179_s12 = int_to_ptr.vmem [resolvable:$true] %s178_s12  ;;  %s201_s4 = int_to_ptr.vmem [resolvable:$true] %s200_s4 }
  0x9b   :  { %s4788_s14 = scalar_lea.vmem %s179_s12, 16  ;;  %s4792_s11 = scalar_lea.vmem %s179_s12, 32 }
  0x9c   :  { %p4789_p9 = scmp.ne.s32.totalorder %s179_s12, %s4788_s14  ;;  %p4793_p10 = scmp.lt.s32.totalorder %s179_s12, %s179_s12 }
  0x9d   :  { %p4794_p11 = scmp.lt.s32.totalorder %s4792_s11, %s4788_s14 }
  0x9f   :  { %p4795_p12 = por %p4794_p11, %p4793_p10 }
  0xa1   :  { %p4796_p13 = pnand %p4795_p12, %p4789_p9 }
  0xa3   :  { %4799 = shalt.err (!%p4796_p13)
}
  0xa4   :  { %181 = dma.hbm_to_vmem [thread:$0]  %s5632_s15, 16, %s179_s12, [#allocation21]  }
  0xa5   :  { %s4808_s30 = scalar_lea.vmem %s201_s4, 16  ;;  %s4812_s13 = scalar_lea.vmem %s201_s4, 32 }
  0xa6   :  { %p4809_p0 = scmp.ne.s32.totalorder %s201_s4, %s4808_s30  ;;  %p4813_p1 = scmp.lt.s32.totalorder %s201_s4, %s201_s4 }
  0xa7   :  { %p4814_p2 = scmp.lt.s32.totalorder %s4812_s13, %s4808_s30 }
  0xa9   :  { %p4815_p3 = por %p4814_p2, %p4813_p1 }
  0xab   :  { %p4816_p4 = pnand %p4815_p3, %p4809_p0 }
  0xad   :  { %4819 = shalt.err (!%p4816_p4)
}
  0xae   :  { %203 = dma.hbm_to_vmem [thread:$0]  %s5634_s17, 16, %s201_s4, [#allocation24]  }
  0xaf   :  { %4840 = dma.done.wait [#allocation3], 256  }
  0xb0   :  { %4841 = vsyncadd [#allocation3], 4294967040 }
  0xb1   :  { %4842 = dma.done.wait [#allocation6], 288  }
  0xb2   :  { %4843 = vsyncadd [#allocation6], 4294967008 }
  0xb3   :  { %4844 = dma.done.wait [#allocation9], 128  }
  0xb4   :  { %4845 = vsyncadd [#allocation9], 4294967168 }
  0xb5   :  { %4846 = dma.done.wait [#allocation12], 32  }
  0xb6   :  { %4847 = vsyncadd [#allocation12], 4294967264 }
  0xb7   :  { %4848 = dma.done.wait [#allocation15], 528  }
  0xb8   :  { %4849 = vsyncadd [#allocation15], 4294966768 }
  0xb9   :  { %4850 = dma.done.wait [#allocation18], 528  }
  0xba   :  { %4851 = vsyncadd [#allocation18], 4294966768 }
  0xbb   :  { %4852 = dma.done.wait [#allocation21], 528  }
  0xbc   :  { %4853 = vsyncadd [#allocation21], 4294966768 }
  0xbd   :  { %4854 = dma.done.wait [#allocation24], 528  }
  0xbe   :  { %4855 = vsyncadd [#allocation24], 4294966768  ;;  %vm261_vm0 = vcmask 261120   ;;  %v5062_v0 = vld [vmem:[#allocation2] sm:$0xff]  ;;  %v5064_v1 = vld [vmem:[#allocation2 + $0x8] sm:$0xff]  ;;  %v4877_v34 = vmov 0.0  }
  0xbf   :  { %v262_v2 = vsel %vm261_vm0, %v5062_v0, 0.0  ;;  %v265_v3 = vsel %vm261_vm0, %v5064_v1, 0.0  ;;  %v304_v14 = vld [vmem:[%s5623_s6 + $0x18] sm:$0xff]  ;;  %v303_v15 = vld [vmem:[%s5623_s6 + $0x10] sm:$0xff]  ;;  %v302_v16 = vld [vmem:[%s5623_s6 + $0x8] sm:$0xff]  ;;  %4151 = vmatprep.subr.mxu0 %v4877_v34  ;;  %vm4878_vm1 = vmmov 0  }
  0xc0   :  { %263 = vadd.xlane.f32.xlu0 %v262_v2  ;;  %4130 = vmatprep.subr.mxu1 %v304_v14  ;;  %v301_v17 = vld [vmem:[%s5623_s6] sm:$0xff]  ;;  %v3909_v35 = vld [vmem:[#allocation11] ss:$0 sm:$0xff]  ;;  %s4879_s6 = smov 96   ;;  %s4880_s22 = smov 88   ;;  %vm399_vm2 = vcmask 64512  }
  0xc1   :  { %4131 = vmatpush3.msra.mxu1 %v304_v14  ;;  %v3907_v25 = vld [vmem:[#allocation8] ss:$0 sm:$0xff]  ;;  %v3908_v27 = vld [vmem:[#allocation10] ss:$0 sm:$0xff]  ;;  %4153 = vmatprep.mubr.msk.f32.mxu0 %vm4878_vm1, %v4877_v34  ;;  %s4881_s9 = smov 120   ;;  %s4882_s26 = smov 72  }
  0xc2   :  { %4132 = vmatprep.subr.mxu1 %v303_v15  ;;  %s4883_s27 = smov 80   ;;  %s4884_s28 = smov 104   ;;  %v393_v54 = vld [vmem:[#allocation5] sm:$0xff]  ;;  %v395_v58 = vld [vmem:[#allocation5 + $0x8] sm:$0xff]  ;;  %vm1450_vm5 = vcmask 130048   ;;  %vm1452_vm6 = vcmask 195584  }
  0xc3   :  { %4133 = vmatpush3.msra.mxu1 %v303_v15  ;;  %s4885_s12 = smov 112   ;;  %vm1019_vm3 = vcmp.gt.f32.partialorder %v393_v54, 0.0  ;;  %vm1020_vm4 = vcmp.gt.f32.partialorder %v395_v58, 0.0  ;;  %s4886_s24 = smov 56   ;;  %vm3788_vm9 = vcmask 523264  }
  0xc4   :  { %266 = vadd.xlane.f32.xlu0 %v265_v3  ;;  %4134 = vmatprep.subr.mxu1 %v302_v16  ;;  %v5169_v55 = vsel %vm1019_vm3, 1.0, %v4877_v34  ;;  %v5174_v3 = vsel %vm1020_vm4, 1.0, %v4877_v34  ;;  %s4887_s4 = smov 48   ;;  %s4888_s14 = smov 64  }
  0xc5   :  { %4135 = vmatpush3.msra.mxu1 %v302_v16  ;;  %v3930_v56 = vadd.f32 -1.0, %v5169_v55  ;;  %s4889_s11 = smov 40   ;;  %s4890_s21 = smov 24  }
  0xc6   :  { %4136 = vmatprep.subr.mxu1 %v301_v17  ;;  %s5649_s10 = sld [smem:[#allocation38_spill]] }
  0xc7   :  { %4137 = vmatpush3.msra.mxu1 %v301_v17  ;;  %v1027_v57 = vmul.f32 1e+30, %v3930_v56 }
  0xc8   :  { %4141 = vmatprep.subr.mxu1 %v4877_v34 }
 0x149   :  { %v264_v4 = vpop.xlane.xlu0 %263 }
 0x14a   :  { %v269_v5 = vmul.f32 0.03125, %v264_v4 }
 0x14c   :  { %v271_v6 = vsub.f32 %v5062_v0, %v269_v5 }
 0x14d   :  { %v267_v7 = vpop.xlane.xlu0 %266 }
 0x14e   :  { %v270_v8 = vmul.f32 0.03125, %v267_v7  ;;  %v273_v9 = vmul.f32 %v271_v6, %v271_v6 }
 0x150   :  { %v272_v10 = vsub.f32 %v5064_v1, %v270_v8  ;;  %v275_v11 = vsel %vm261_vm0, %v273_v9, 0.0 }
 0x151   :  { %276 = vadd.xlane.f32.xlu1 %v275_v11 }
 0x152   :  { %v274_v12 = vmul.f32 %v272_v10, %v272_v10 }
 0x154   :  { %v278_v13 = vsel %vm261_vm0, %v274_v12, 0.0 }
 0x155   :  { %279 = vadd.xlane.f32.xlu1 %v278_v13 }
 0x1da   :  { %v277_v18 = vpop.xlane.xlu1 %276 }
 0x1db   :  { %v281_v19 = vmul.f32 0.03125, %v277_v18 }
 0x1dd   :  { %v283_v20 = vadd.f32 1e-12, %v281_v19 }
 0x1de   :  { %v280_v21 = vpop.xlane.xlu1 %279 }
 0x1df   :  { %4444 = vrsqrt.f32 %v283_v20  ;;  %v282_v22 = vmul.f32 0.03125, %v280_v21 }
 0x1e1   :  { %v284_v23 = vadd.f32 1e-12, %v282_v22 }
 0x1e3   :  { %4446 = vrsqrt.f32 %v284_v23 }
 0x1ec   :  { %v4445_v24 = vpop.eup %4444 }
 0x1ed   :  { %v287_v26 = vmul.f32 %v4445_v24, %v271_v6  ;;  %v3931_v6 = vadd.f32 -1.0, %v5174_v3 }
 0x1ef   :  { %v293_v28 = vmul.f32 %v3907_v25, %v287_v26  ;;  %v1028_v11 = vmul.f32 1e+30, %v3931_v6 }
 0x1f0   :  { %v4447_v29 = vpop.eup %4446 }
 0x1f1   :  { %v288_v30 = vmul.f32 %v4447_v29, %v272_v10  ;;  %v299_v31 = vadd.f32 %v3908_v27, %v293_v28 }
 0x1f3   :  { %v294_v32 = vmul.f32 %v3907_v25, %v288_v30  ;;  %4138 = vmatprep.mubr.msk.f32.mxu1 %vm261_vm0, %v299_v31 }
 0x1f5   :  { %v300_v33 = vadd.f32 %v3908_v27, %v294_v32 }
 0x1f7   :  { %4139 = vmatmul.mubr.msk.f32.vlgmr.msra.gmra.mxu1 %vm261_vm0, %v300_v33 }
 0x1f8   :  { %4143 = vmatprep.mubr.msk.f32.mxu1 %vm4878_vm1, %v4877_v34 }
 0x2b7   :  { %v4140_v36 = vpop.f32.mrf.mxu1 }
 0x2b8   :  { %v5094_v37 = vadd.f32 %v4140_v36, %v3909_v35 }
 0x2b9   :  { %v384_v38 = vpop.f32.mrf.mxu1 }
 0x2ba   :  { %v5096_v39 = vadd.f32 %v3909_v35, %v384_v38  ;;  %709 = vrot.lane.b32.xlu1 %v5094_v37, %s4879_s6 }
 0x2bc   :  { %397 = vrot.lane.b32.xlu0 %v5096_v39, %s4879_s6 }
 0x2be   :  { %476 = vrot.lane.b32.xlu1 %v5096_v39, %s4880_s22 }
 0x2c0   :  { %787 = vrot.lane.b32.xlu0 %v5094_v37, %s4880_s22 }
 0x2c2   :  { %474 = vrot.lane.b32.xlu1 %v5096_v39, %s4881_s9 }
 0x2c4   :  { %632 = vrot.lane.b32.xlu0 %v5096_v39, %s4882_s26 }
 0x2c6   :  { %554 = vrot.lane.b32.xlu1 %v5096_v39, %s4883_s27 }
 0x2c8   :  { %630 = vrot.lane.b32.xlu0 %v5096_v39, %s4884_s28 }
 0x2ca   :  { %552 = vrot.lane.b32.xlu1 %v5096_v39, %s4885_s12 }
 0x2cc   :  { %865 = vrot.lane.b32.xlu0 %v5094_v37, %s4883_s27 }
 0x2ce   :  { %785 = vrot.lane.b32.xlu1 %v5094_v37, %s4881_s9 }
 0x2d0   :  { %863 = vrot.lane.b32.xlu0 %v5094_v37, %s4885_s12 }
 0x2d2   :  { %943 = vrot.lane.b32.xlu1 %v5094_v37, %s4882_s26 }
 0x2d6   :  { %941 = vrot.lane.b32.xlu1 %v5094_v37, %s4884_s28 }
 0x32c   :  { %v710_v40 = vpop.permute.xlu1 %709 }
 0x32e   :  { %v398_v41 = vpop.permute.xlu0 %397 }
 0x32f   :  { %4142 = vmatpush3.xpose.msk.msra.mxu1 %vm399_vm2, %v398_v41 }
 0x330   :  { %v477_v42 = vpop.permute.xlu1 %476  ;;  %4146 = vmatprep.subr.mxu1 %v4877_v34 }
 0x332   :  { %4144 = vmatmul.mubr.msk.f32.vlgmr.msra.gmra.mxu1 %vm399_vm2, %v5096_v39  ;;  %v788_v43 = vpop.permute.xlu0 %787 }
 0x333   :  { %4147 = vmatpush3.xpose.msk.msra.mxu1 %vm399_vm2, %v477_v42  ;;  %4148 = vmatprep.mubr.msk.f32.mxu1 %vm4878_vm1, %v4877_v34 }
 0x334   :  { %v475_v44 = vpop.permute.xlu1 %474  ;;  %4156 = vmatprep.subr.mxu1 %v4877_v34 }
 0x336   :  { %4149 = vmatmul.mubr.msk.f32.vlgmr.msra.gmra.mxu1 %vm399_vm2, %v475_v44  ;;  %v633_v45 = vpop.permute.xlu0 %632 }
 0x337   :  { %4157 = vmatpush3.xpose.msk.msra.mxu1 %vm399_vm2, %v633_v45  ;;  %4158 = vmatprep.mubr.msk.f32.mxu1 %vm4878_vm1, %v4877_v34 }
 0x338   :  { %v555_v46 = vpop.permute.xlu1 %554  ;;  %4166 = vmatprep.subr.mxu1 %v4877_v34 }
 0x339   :  { %4152 = vmatpush3.xpose.msk.msra.mxu0 %vm399_vm2, %v555_v46 }
 0x33a   :  { %v631_v47 = vpop.permute.xlu0 %630  ;;  %4161 = vmatprep.subr.mxu0 %v4877_v34 }
 0x33b   :  { %4159 = vmatmul.mubr.msk.f32.vlgmr.msra.gmra.mxu1 %vm399_vm2, %v631_v47 }
 0x33c   :  { %4167 = vmatpush3.xpose.msk.msra.mxu1 %vm399_vm2, %v788_v43  ;;  %v553_v48 = vpop.permute.xlu1 %552  ;;  %4168 = vmatprep.mubr.msk.f32.mxu1 %vm4878_vm1, %v4877_v34 }
 0x33d   :  { %4154 = vmatmul.mubr.msk.f32.vlgmr.msra.gmra.mxu0 %vm399_vm2, %v553_v48  ;;  %4176 = vmatprep.subr.mxu1 %v4877_v34 }
 0x33e   :  { %4162 = vmatpush3.xpose.msk.msra.mxu0 %vm399_vm2, %v710_v40  ;;  %v866_v49 = vpop.permute.xlu0 %865  ;;  %4163 = vmatprep.mubr.msk.f32.mxu0 %vm4878_vm1, %v4877_v34 }
 0x33f   :  { %4171 = vmatprep.subr.mxu0 %v4877_v34 }
 0x340   :  { %v786_v50 = vpop.permute.xlu1 %785 }
 0x341   :  { %4164 = vmatmul.mubr.msk.f32.vlgmr.msra.gmra.mxu0 %vm399_vm2, %v5094_v37  ;;  %4169 = vmatmul.mubr.msk.f32.vlgmr.msra.gmra.mxu1 %vm399_vm2, %v786_v50 }
 0x342   :  { %4172 = vmatpush3.xpose.msk.msra.mxu0 %vm399_vm2, %v866_v49  ;;  %4173 = vmatprep.mubr.msk.f32.mxu0 %vm4878_vm1, %v4877_v34  ;;  %v864_v51 = vpop.permute.xlu0 %863 }
 0x343   :  { %4178 = vmatprep.mubr.msk.f32.mxu1 %vm4878_vm1, %v4877_v34  ;;  %4181 = vmatprep.subr.mxu0 %v4877_v34 }
 0x344   :  { %v944_v52 = vpop.permute.xlu1 %943 }
 0x345   :  { %4174 = vmatmul.mubr.msk.f32.vlgmr.msra.gmra.mxu0 %vm399_vm2, %v864_v51  ;;  %4177 = vmatpush3.xpose.msk.msra.mxu1 %vm399_vm2, %v944_v52 }
 0x346   :  { %4186 = vmatprep.subr.mxu1 %v4877_v34  ;;  %4183 = vmatprep.mubr.msk.f32.mxu0 %vm4878_vm1, %v4877_v34 }
 0x348   :  { %v942_v53 = vpop.permute.xlu1 %941 }
 0x349   :  { %4179 = vmatmul.mubr.msk.f32.vlgmr.msra.gmra.mxu1 %vm399_vm2, %v942_v53 }
 0x34a   :  { %4188 = vmatprep.mubr.msk.f32.mxu1 %vm4878_vm1, %v4877_v34 }
 0x3f2   :  { %v470_v59 = vpop.f32.mrf.mxu1 }
 0x3f3   :  { %v1029_v60 = vadd.f32 %v1027_v57, %v470_v59 }
 0x3f4   :  { %v4145_v61 = vpop.f32.mrf.mxu1 }
 0x3f5   :  { %v1037_v62 = vsel %vm399_vm2, %v1029_v60, -inf }
 0x3f6   :  { %1038 = vmax.xlane.f32.xlu0 %v1037_v62  ;;  %v548_v63 = vpop.f32.mrf.mxu1 }
 0x3f7   :  { %v1030_v2 = vadd.f32 %v1027_v57, %v548_v63 }
 0x3f8   :  { %v4150_v4 = vpop.f32.mrf.mxu1 }
 0x3f9   :  { %v1040_v5 = vsel %vm399_vm2, %v1030_v2, -inf }
 0x3fa   :  { %1041 = vmax.xlane.f32.xlu1 %v1040_v5 }
 0x3fb   :  { %v704_v7 = vpop.f32.mrf.mxu1 }
 0x3fc   :  { %v1032_v13 = vadd.f32 %v1027_v57, %v704_v7 }
 0x3fd   :  { %v626_v8 = vpop.f32.mrf.mxu0  ;;  %v4160_v9 = vpop.f32.mrf.mxu1 }
 0x3fe   :  { %v1031_v10 = vadd.f32 %v1027_v57, %v626_v8  ;;  %v1046_v21 = vsel %vm399_vm2, %v1032_v13, -inf }
 0x3ff   :  { %v4155_v12 = vpop.f32.mrf.mxu0 }
 0x400   :  { %v1043_v14 = vsel %vm399_vm2, %v1031_v10, -inf }
 0x401   :  { %v781_v15 = vpop.f32.mrf.mxu0  ;;  %1044 = vmax.xlane.f32.xlu0 %v1043_v14  ;;  %v859_v16 = vpop.f32.mrf.mxu1 }
 0x402   :  { %v1034_v17 = vadd.f32 %v1028_v11, %v859_v16  ;;  %v1033_v20 = vadd.f32 %v1028_v11, %v781_v15 }
 0x403   :  { %v4165_v18 = vpop.f32.mrf.mxu0  ;;  %v4170_v19 = vpop.f32.mrf.mxu1 }
 0x404   :  { %v1052_v22 = vsel %vm399_vm2, %v1034_v17, -inf  ;;  %v1049_v26 = vsel %vm399_vm2, %v1033_v20, -inf }
 0x405   :  { %1047 = vmax.xlane.f32.xlu0 %v1046_v21  ;;  %1053 = vmax.xlane.f32.xlu1 %v1052_v22  ;;  %v937_v23 = vpop.f32.mrf.mxu0 }
 0x406   :  { %v1035_v25 = vadd.f32 %v1028_v11, %v937_v23 }
 0x407   :  { %v4175_v24 = vpop.f32.mrf.mxu0 }
 0x408   :  { %v1055_v31 = vsel %vm399_vm2, %v1035_v25, -inf }
 0x409   :  { %1050 = vmax.xlane.f32.xlu0 %v1049_v26  ;;  %v1015_v27 = vpop.f32.mrf.mxu1 }
 0x40a   :  { %v1036_v28 = vadd.f32 %v1028_v11, %v1015_v27 }
 0x40b   :  { %v4180_v29 = vpop.f32.mrf.mxu1 }
 0x40c   :  { %v1058_v30 = vsel %vm399_vm2, %v1036_v28, -inf }
 0x40d   :  { %1059 = vmax.xlane.f32.xlu1 %v1058_v30  ;;  %1056 = vmax.xlane.f32.xlu0 %v1055_v31 }
 0x41e   :  { %1209 = vrot.lane.b32.xlu1 %v5096_v39, %s4886_s24 }
 0x422   :  { %1285 = vrot.lane.b32.xlu1 %v5096_v39, %s4887_s4 }
 0x423   :  { %1133 = vrot.lane.b32.xlu0 %v5096_v39, %s4888_s14 }
 0x426   :  { %1361 = vrot.lane.b32.xlu1 %v5096_v39, %s4889_s11 }
 0x427   :  { %1454 = vrot.lane.b32.xlu0 %v5094_v37, %s4888_s14 }
 0x42a   :  { %1530 = vrot.lane.b32.xlu1 %v5094_v37, %s4886_s24 }
 0x47f   :  { %v1039_v32 = vpop.xlane.xlu0 %1038 }
 0x480   :  { %v1061_v33 = vsub.f32 %v1029_v60, %v1039_v32 }
 0x482   :  { %v1069_v35 = vmul.f32 1.442695, %v1061_v33 }
 0x483   :  { %v1042_v36 = vpop.xlane.xlu1 %1041 }
 0x484   :  { %4448 = vpow2.f32 %v1069_v35  ;;  %v1062_v38 = vsub.f32 %v1030_v2, %v1042_v36 }
 0x486   :  { %v1071_v40 = vmul.f32 1.442695, %v1062_v38 }
 0x488   :  { %4450 = vpow2.f32 %v1071_v40 }
 0x48a   :  { %v1045_v41 = vpop.xlane.xlu0 %1044 }
 0x48b   :  { %v1063_v42 = vsub.f32 %v1031_v10, %v1045_v41 }
 0x48d   :  { %v1073_v43 = vmul.f32 1.442695, %v1063_v42 }
 0x48e   :  { %v1054_v44 = vpop.xlane.xlu1 %1053  ;;  %v1048_v45 = vpop.xlane.xlu0 %1047 }
 0x48f   :  { %4452 = vpow2.f32 %v1073_v43  ;;  %v1066_v46 = vsub.f32 %v1034_v17, %v1054_v44  ;;  %v1064_v39 = vsub.f32 %v1032_v13, %v1048_v45 }
 0x491   :  { %v4449_v47 = vpop.eup %4448  ;;  %v1075_v48 = vmul.f32 1.442695, %v1064_v39  ;;  %v1079_v49 = vmul.f32 1.442695, %v1066_v46 }
 0x492   :  { %v1051_v50 = vpop.xlane.xlu0 %1050  ;;  %v1085_v51 = vsel %vm399_vm2, %v4449_v47, 0.0 }
 0x493   :  { %v1065_v52 = vsub.f32 %v1033_v20, %v1051_v50  ;;  %1086 = vadd.xlane.f32.xlu0 %v1085_v51  ;;  %4454 = vpow2.f32 %v1075_v48 }
 0x494   :  { %4456 = vpow2.f32 %v1079_v49 }
 0x495   :  { %v4451_v53 = vpop.eup %4450  ;;  %v1077_v54 = vmul.f32 1.442695, %v1065_v52 }
 0x496   :  { %v1060_v56 = vpop.xlane.xlu1 %1059  ;;  %v1057_v57 = vpop.xlane.xlu0 %1056  ;;  %v1088_v58 = vsel %vm399_vm2, %v4451_v53, 0.0 }
 0x497   :  { %4458 = vpow2.f32 %v1077_v54  ;;  %v1068_v59 = vsub.f32 %v1036_v28, %v1060_v56  ;;  %v1067_v60 = vsub.f32 %v1035_v25, %v1057_v57  ;;  %1089 = vadd.xlane.f32.xlu1 %v1088_v58  ;;  %v1776_v58 = vld [vmem:[%s5625_s8 + $0x18] sm:$0xff] }
 0x499   :  { %v1083_v61 = vmul.f32 1.442695, %v1068_v59  ;;  %v1081_v62 = vmul.f32 1.442695, %v1067_v60  ;;  %v1774_v60 = vld [vmem:[%s5625_s8 + $0x8] sm:$0xff] }
 0x49a   :  { %v1210_v63 = vpop.permute.xlu1 %1209  ;;  %v1134_v2 = vpop.permute.xlu0 %1133 }
 0x49b   :  { %4460 = vpow2.f32 %v1083_v61  ;;  %4182 = vmatpush3.msra.mxu0 %v1134_v2  ;;  %4187 = vmatpush3.msra.mxu1 %v1210_v63 }
 0x49c   :  { %v4453_v4 = vpop.eup %4452  ;;  %4462 = vpow2.f32 %v1081_v62  ;;  %4191 = vmatprep.subr.mxu0 %v4877_v34  ;;  %4196 = vmatprep.subr.mxu1 %v4877_v34  ;;  %v1773_v62 = vld [vmem:[%s5625_s8] sm:$0xff] }
 0x49d   :  { %v1091_v5 = vsel %vm399_vm2, %v4453_v4, 0.0 }
 0x49e   :  { %1092 = vadd.xlane.f32.xlu0 %v1091_v5  ;;  %v1286_v16 = vpop.permute.xlu1 %1285  ;;  %v1455_v18 = vpop.permute.xlu0 %1454 }
 0x4a0   :  { %v4455_v6 = vpop.eup %4454 }
 0x4a1   :  { %v1094_v7 = vsel %vm399_vm2, %v4455_v6, 0.0  ;;  %v5198_v8 = vpop.eup %4456 }
 0x4a2   :  { %1095 = vadd.xlane.f32.xlu1 %v1094_v7  ;;  %v1100_v11 = vsel %vm399_vm2, %v5198_v8, 0.0  ;;  %v1362_v17 = vpop.permute.xlu1 %1361 }
 0x4a4   :  { %v4459_v9 = vpop.eup %4458 }
 0x4a5   :  { %v1097_v10 = vsel %vm399_vm2, %v4459_v9, 0.0 }
 0x4a6   :  { %1098 = vadd.xlane.f32.xlu0 %v1097_v10  ;;  %1101 = vadd.xlane.f32.xlu1 %v1100_v11  ;;  %v1531_v19 = vpop.permute.xlu1 %1530 }
 0x4a8   :  { %v5203_v12 = vpop.eup %4460 }
 0x4a9   :  { %v5205_v13 = vpop.eup %4462  ;;  %v1106_v14 = vsel %vm399_vm2, %v5203_v12, 0.0 }
 0x4aa   :  { %v1103_v15 = vsel %vm399_vm2, %v5205_v13, 0.0  ;;  %1107 = vadd.xlane.f32.xlu1 %v1106_v14 }
 0x4ab   :  { %1104 = vadd.xlane.f32.xlu0 %v1103_v15 }
 0x4bb   :  { %1682 = vrot.lane.b32.xlu1 %v5094_v37, %s4889_s11 }
 0x4c1   :  { %1606 = vrot.lane.b32.xlu0 %v5094_v37, %s4887_s4 }
 0x51c   :  { %v1087_v20 = vpop.xlane.xlu0 %1086 }
 0x51d   :  { %4464 = vrcp.f32 %v1087_v20 }
 0x520   :  { %v1090_v21 = vpop.xlane.xlu1 %1089 }
 0x521   :  { %4466 = vrcp.f32 %v1090_v21 }
 0x527   :  { %v1093_v22 = vpop.xlane.xlu0 %1092 }
 0x528   :  { %4468 = vrcp.f32 %v1093_v22 }
 0x52a   :  { %v4465_v23 = vpop.eup %4464 }
 0x52b   :  { %v1117_v24 = vmul.f32 %v4465_v23, %v4449_v47  ;;  %v1096_v25 = vpop.xlane.xlu1 %1095 }
 0x52c   :  { %4470 = vrcp.f32 %v1096_v25 }
 0x52d   :  { %v1125_v26 = vmul.f32 %v5169_v55, %v1117_v24 }
 0x52e   :  { %v4467_v27 = vpop.eup %4466 }
 0x52f   :  { %4184 = vmatmul.mubr.msk.f32.vlgmr.msra.gmra.mxu0 %vm399_vm2, %v1125_v26  ;;  %v1099_v37 = vpop.xlane.xlu0 %1098  ;;  %v1118_v28 = vmul.f32 %v4467_v27, %v4451_v53  ;;  %v1102_v29 = vpop.xlane.xlu1 %1101  ;;  %v3942_v26 = vld [vmem:[#allocation13] ss:$0 sm:$0xff] }
 0x530   :  { %4192 = vmatpush3.msra.mxu0 %v1286_v16  ;;  %4472 = vrcp.f32 %v1099_v37  ;;  %4193 = vmatprep.mubr.msk.f32.mxu0 %vm4878_vm1, %v4877_v34 }
 0x531   :  { %4474 = vrcp.f32 %v1102_v29  ;;  %v1126_v30 = vmul.f32 %v5169_v55, %v1118_v28  ;;  %4201 = vmatprep.subr.mxu0 %v4877_v34 }
 0x533   :  { %4189 = vmatmul.mubr.msk.f32.vlgmr.msra.gmra.mxu1 %vm399_vm2, %v1126_v30  ;;  %v1108_v31 = vpop.xlane.xlu1 %1107 }
 0x534   :  { %4197 = vmatpush3.msra.mxu1 %v1362_v17  ;;  %v1105_v32 = vpop.xlane.xlu0 %1104  ;;  %4198 = vmatprep.mubr.msk.f32.mxu1 %vm4878_vm1, %v4877_v34  ;;  %4476 = vrcp.f32 %v1108_v31 }
 0x535   :  { %v4469_v33 = vpop.eup %4468  ;;  %4206 = vmatprep.subr.mxu1 %v4877_v34  ;;  %4478 = vrcp.f32 %v1105_v32 }
 0x536   :  { %v1119_v35 = vmul.f32 %v4469_v33, %v4453_v4  ;;  %v2004_v33 = vld [vmem:[#allocation17 + $0x18] sm:$0xff] }
 0x537   :  { %v1683_v49 = vpop.permute.xlu1 %1682 }
 0x538   :  { %v1127_v36 = vmul.f32 %v5169_v55, %v1119_v35  ;;  %v1607_v48 = vpop.permute.xlu0 %1606 }
 0x539   :  { %v4471_v38 = vpop.eup %4470 }
 0x53a   :  { %4194 = vmatmul.mubr.msk.f32.vlgmr.msra.gmra.mxu0 %vm399_vm2, %v1127_v36  ;;  %v1120_v40 = vmul.f32 %v4471_v38, %v4455_v6 }
 0x53b   :  { %4202 = vmatpush3.msra.mxu0 %v1455_v18  ;;  %4203 = vmatprep.mubr.msk.f32.mxu0 %vm4878_vm1, %v4877_v34 }
 0x53c   :  { %4211 = vmatprep.subr.mxu0 %v4877_v34  ;;  %v1128_v42 = vmul.f32 %v5169_v55, %v1120_v40 }
 0x53d   :  { %v4473_v41 = vpop.eup %4472 }
 0x53e   :  { %v4475_v43 = vpop.eup %4474  ;;  %v1121_v44 = vmul.f32 %v4473_v41, %v4459_v9  ;;  %4199 = vmatmul.mubr.msk.f32.vlgmr.msra.gmra.mxu1 %vm399_vm2, %v1128_v42 }
 0x53f   :  { %v1122_v45 = vmul.f32 %v4475_v43, %v5198_v8  ;;  %4207 = vmatpush3.msra.mxu1 %v1531_v19  ;;  %4208 = vmatprep.mubr.msk.f32.mxu1 %vm4878_vm1, %v4877_v34 }
 0x540   :  { %v1129_v46 = vmul.f32 %v5174_v3, %v1121_v44  ;;  %4216 = vmatprep.subr.mxu1 %v4877_v34 }
 0x541   :  { %v1130_v39 = vmul.f32 %v5174_v3, %v1122_v45  ;;  %v4477_v47 = vpop.eup %4476  ;;  %v2003_v45 = vld [vmem:[#allocation17 + $0x10] sm:$0xff] }
 0x542   :  { %4204 = vmatmul.mubr.msk.f32.vlgmr.msra.gmra.mxu0 %vm399_vm2, %v1129_v46  ;;  %v4479_v55 = vpop.eup %4478  ;;  %v1124_v50 = vmul.f32 %v4477_v47, %v5203_v12  ;;  %v2002_v46 = vld [vmem:[#allocation17 + $0x8] sm:$0xff]  ;;  %v255_v47 = vld [vmem:[%s5649_s10] sm:$0xff] }
 0x543   :  { %4209 = vmatmul.mubr.msk.f32.vlgmr.msra.gmra.mxu1 %vm399_vm2, %v1130_v39  ;;  %4212 = vmatpush3.msra.mxu0 %v1607_v48  ;;  %v1123_v51 = vmul.f32 %v4479_v55, %v5205_v13  ;;  %v2001_v39 = vld [vmem:[#allocation17] sm:$0xff]  ;;  %v256_v48 = vld [vmem:[%s5649_s10 + $0x8] sm:$0xff] }
 0x544   :  { %4217 = vmatpush3.msra.mxu1 %v1683_v49  ;;  %4213 = vmatprep.mubr.msk.f32.mxu0 %vm4878_vm1, %v4877_v34  ;;  %v1132_v52 = vmul.f32 %v5174_v3, %v1124_v50  ;;  %v1912_v55 = vld [vmem:[#allocation14 + $0x18] sm:$0xff]  ;;  %v1911_v49 = vld [vmem:[#allocation14 + $0x10] sm:$0xff]  ;;  %v1910_v50 = vld [vmem:[#allocation14 + $0x8] sm:$0xff] }
 0x545   :  { %4218 = vmatprep.mubr.msk.f32.mxu1 %vm4878_vm1, %v4877_v34  ;;  %v1131_v53 = vmul.f32 %v5174_v3, %v1123_v51  ;;  %4221 = vmatprep.subr.mxu0 %v1776_v58  ;;  %v1775_v3 = vld [vmem:[%s5625_s8 + $0x10] sm:$0xff] }
 0x546   :  { %4232 = vmatprep.subr.mxu1 %v1912_v55  ;;  %v1909_v51 = vld [vmem:[#allocation14] sm:$0xff] }
 0x547   :  { %4219 = vmatmul.mubr.msk.f32.vlgmr.msra.gmra.mxu1 %vm399_vm2, %v1132_v52  ;;  %4214 = vmatmul.mubr.msk.f32.vlgmr.msra.gmra.mxu0 %vm399_vm2, %v1131_v53  ;;  %v257_v52 = vld [vmem:[%s5649_s10 + $0x10] sm:$0xff]  ;;  %v258_v53 = vld [vmem:[%s5649_s10 + $0x18] sm:$0xff] }
 0x548   :  { %4222 = vmatpush3.msra.mxu0 %v1776_v58  ;;  %4233 = vmatpush3.msra.mxu1 %v1912_v55 }
 0x549   :  { %4223 = vmatprep.subr.mxu0 %v1775_v3  ;;  %4234 = vmatprep.subr.mxu1 %v1911_v49 }
 0x54a   :  { %4224 = vmatpush3.msra.mxu0 %v1775_v3  ;;  %4235 = vmatpush3.msra.mxu1 %v1911_v49 }
 0x54b   :  { %4225 = vmatprep.subr.mxu0 %v1774_v60  ;;  %4236 = vmatprep.subr.mxu1 %v1910_v50 }
 0x54c   :  { %4226 = vmatpush3.msra.mxu0 %v1774_v60  ;;  %4237 = vmatpush3.msra.mxu1 %v1910_v50 }
 0x54d   :  { %4227 = vmatprep.subr.mxu0 %v1773_v62  ;;  %4238 = vmatprep.subr.mxu1 %v1909_v51 }
 0x54e   :  { %4228 = vmatpush3.msra.mxu0 %v1773_v62  ;;  %4239 = vmatpush3.msra.mxu1 %v1909_v51 }
 0x54f   :  { %4243 = vmatprep.subr.mxu0 %v2004_v33  ;;  %4257 = vmatprep.subr.mxu1 %v4877_v34 }
 0x5ef   :  { %v1205_v54 = vpop.f32.mrf.mxu0 }
 0x5f1   :  { %v4185_v56 = vpop.f32.mrf.mxu0 }
 0x5f3   :  { %v1281_v57 = vpop.f32.mrf.mxu1 }
 0x5f4   :  { %1438 = vrot.lane.b32.xlu0 %v1281_v57, %s4861_s3 }
 0x5f5   :  { %v4190_v59 = vpop.f32.mrf.mxu1 }
 0x5fa   :  { %v1357_v61 = vpop.f32.mrf.mxu0 }
 0x5fb   :  { %1442 = vrot.lane.b32.xlu1 %v1357_v61, %s4869_s16  ;;  %v3943_v61 = vld [vmem:[#allocation8 + $0x1] ss:$0 sm:$0xff] }
 0x5fc   :  { %v4195_v63 = vpop.f32.mrf.mxu0 }
 0x5fd   :  { %v3944_v63 = vld [vmem:[#allocation10 + $0x1] ss:$0 sm:$0xff] }
 0x5fe   :  { %v1433_v2 = vpop.f32.mrf.mxu1 }
 0x5ff   :  { %1446 = vrot.lane.b32.xlu1 %v1433_v2, %s4890_s21 }
 0x600   :  { %v4200_v4 = vpop.f32.mrf.mxu1 }
 0x602   :  { %v1526_v5 = vpop.f32.mrf.mxu0 }
 0x603   :  { %v1602_v6 = vpop.f32.mrf.mxu1 }
 0x604   :  { %1759 = vrot.lane.b32.xlu0 %v1602_v6, %s4861_s3  ;;  %v4205_v7 = vpop.f32.mrf.mxu0 }
 0x605   :  { %v4210_v8 = vpop.f32.mrf.mxu1 }
 0x607   :  { %v1754_v9 = vpop.f32.mrf.mxu1  ;;  %v1678_v10 = vpop.f32.mrf.mxu0 }
 0x608   :  { %1767 = vrot.lane.b32.xlu1 %v1754_v9, %s4890_s21  ;;  %1763 = vrot.lane.b32.xlu0 %v1678_v10, %s4869_s16  ;;  %v3948_v9 = vld [vmem:[#allocation19] ss:$0 sm:$0xff] }
 0x609   :  { %v4220_v11 = vpop.f32.mrf.mxu1  ;;  %v4215_v12 = vpop.f32.mrf.mxu0 }
 0x666   :  { %v1439_v14 = vpop.permute.xlu0 %1438 }
 0x667   :  { %v1449_v15 = vsel %vm399_vm2, %v1205_v54, %v1439_v14 }
 0x66d   :  { %v1443_v13 = vpop.permute.xlu1 %1442 }
 0x66e   :  { %v1451_v16 = vsel %vm1450_vm5, %v1449_v15, %v1443_v13 }
 0x671   :  { %v1447_v17 = vpop.permute.xlu1 %1446 }
 0x672   :  { %v1453_v18 = vsel %vm1452_vm6, %v1451_v16, %v1447_v17 }
 0x673   :  { %4229 = vmatprep.mubr.msk.f32.mxu0 %vm261_vm0, %v1453_v18 }
 0x676   :  { %v1760_v19 = vpop.permute.xlu0 %1759 }
 0x677   :  { %v1770_v21 = vsel %vm399_vm2, %v1526_v5, %v1760_v19  ;;  %v3945_v19 = vld [vmem:[#allocation16] ss:$0 sm:$0xff] }
 0x67a   :  { %v1768_v20 = vpop.permute.xlu1 %1767  ;;  %v1764_v22 = vpop.permute.xlu0 %1763 }
 0x67b   :  { %v1771_v23 = vsel %vm1450_vm5, %v1770_v21, %v1764_v22 }
 0x67c   :  { %v1772_v24 = vsel %vm1452_vm6, %v1771_v23, %v1768_v20 }
 0x67d   :  { %4230 = vmatmul.mubr.msk.f32.vlgmr.msra.gmra.mxu0 %vm261_vm0, %v1772_v24 }
 0x67e   :  { %4244 = vmatpush3.msra.mxu0 %v2004_v33  ;;  %4251 = vmatprep.mubr.msk.f32.mxu0 %vm261_vm0, %v255_v47 }
 0x67f   :  { %4245 = vmatprep.subr.mxu0 %v2003_v45 }
 0x680   :  { %4246 = vmatpush3.msra.mxu0 %v2003_v45  ;;  %v3953_v45 = vld [vmem:[#allocation7] ss:$0 sm:$0xff] }
 0x681   :  { %4247 = vmatprep.subr.mxu0 %v2002_v46  ;;  %vm2774_vm7 = vcmp.gt.f32.partialorder %v3953_v45, 0.0 }
 0x682   :  { %4248 = vmatpush3.msra.mxu0 %v2002_v46  ;;  %v5419_v46 = vsel %vm2774_vm7, 1.0, %v4877_v34 }
 0x683   :  { %4249 = vmatprep.subr.mxu0 %v2001_v39 }
 0x684   :  { %4250 = vmatpush3.msra.mxu0 %v2001_v39  ;;  %v3981_v39 = vadd.f32 -1.0, %v5419_v46 }
 0x685   :  { %4252 = vmatmul.mubr.msk.f32.vlgmr.msra.gmra.mxu0 %vm261_vm0, %v256_v48  ;;  %4264 = vmatprep.subr.mxu0 %v4877_v34 }
 0x686   :  { %4254 = vmatprep.mubr.msk.f32.mxu0 %vm261_vm0, %v257_v52  ;;  %v2782_v47 = vmul.f32 1e+30, %v3981_v39  ;;  %v3954_v52 = vld [vmem:[#allocation7 + $0x1] ss:$0 sm:$0xff] }
 0x687   :  { %vm2775_vm8 = vcmp.gt.f32.partialorder %v3954_v52, 0.0 }
 0x689   :  { %4255 = vmatmul.mubr.msk.f32.gmra.mxu0 %vm261_vm0, %v258_v53 }
 0x68a   :  { %4268 = vmatprep.mubr.msk.f32.mxu0 %vm4878_vm1, %v4877_v34 }
 0x73d   :  { %v4231_v25 = vpop.f32.mrf.mxu0 }
 0x73e   :  { %v1859_v27 = vadd.f32 %v4231_v25, %v5064_v1 }
 0x73f   :  { %v1849_v37 = vpop.f32.mrf.mxu0 }
 0x740   :  { %v5277_v28 = vadd.f32 %v3942_v26, %v1859_v27  ;;  %v1858_v29 = vadd.f32 %v1849_v37, %v5062_v0 }
 0x742   :  { %v5280_v30 = vadd.f32 %v3942_v26, %v1858_v29  ;;  %v1874_v31 = vsel %vm261_vm0, %v5277_v28, 0.0 }
 0x743   :  { %1875 = vadd.xlane.f32.xlu1 %v1874_v31 }
 0x744   :  { %v1871_v32 = vsel %vm261_vm0, %v5280_v30, 0.0 }
 0x745   :  { %1872 = vadd.xlane.f32.xlu0 %v1871_v32  ;;  %v4253_v10 = vpop.f32.mrf.mxu0 }
 0x746   :  { %v5314_v11 = vadd.f32 %v4253_v10, %v3948_v9 }
 0x747   :  { %v2090_v12 = vpop.f32.mrf.mxu0 }
 0x748   :  { %v5316_v13 = vadd.f32 %v3948_v9, %v2090_v12 }
 0x749   :  { %v4256_v16 = vpop.f32.mrf.mxu0 }
 0x74a   :  { %v5340_v23 = vadd.f32 %v4256_v16, %v3948_v9 }
 0x74b   :  { %v2100_v18 = vpop.f32.mrf.mxu0 }
 0x74c   :  { %v5344_v24 = vadd.f32 %v3948_v9, %v2100_v18 }
 0x754   :  { %2205 = vrot.lane.b32.xlu1 %v5316_v13, %s4881_s9 }
 0x758   :  { %2289 = vrot.lane.b32.xlu1 %v5314_v11, %s4885_s12 }
 0x75c   :  { %2287 = vrot.lane.b32.xlu1 %v5316_v13, %s4885_s12 }
 0x7cc   :  { %v1876_v35 = vpop.xlane.xlu1 %1875 }
 0x7cd   :  { %v1878_v1 = vmul.f32 0.03125, %v1876_v35 }
 0x7ce   :  { %v1873_v36 = vpop.xlane.xlu0 %1872 }
 0x7cf   :  { %v1877_v38 = vmul.f32 0.03125, %v1873_v36  ;;  %v1880_v40 = vsub.f32 %v5277_v28, %v1878_v1 }
 0x7d0   :  { %v2206_v15 = vpop.permute.xlu1 %2205 }
 0x7d1   :  { %v1879_v0 = vsub.f32 %v5280_v30, %v1877_v38  ;;  %v1882_v43 = vmul.f32 %v1880_v40, %v1880_v40 }
 0x7d3   :  { %v1881_v41 = vmul.f32 %v1879_v0, %v1879_v0  ;;  %v1886_v44 = vsel %vm261_vm0, %v1882_v43, 0.0 }
 0x7d4   :  { %v2290_v21 = vpop.permute.xlu1 %2289 }
 0x7d5   :  { %v1883_v42 = vsel %vm261_vm0, %v1881_v41, 0.0 }
 0x7d6   :  { %1884 = vadd.xlane.f32.xlu0 %v1883_v42 }
 0x7d8   :  { %v2288_v25 = vpop.permute.xlu1 %2287 }
 0x7da   :  { %1887 = vadd.xlane.f32.xlu0 %v1886_v44 }
 0x7f0   :  { %2207 = vrot.lane.b32.xlu0 %v5314_v11, %s4881_s9 }
 0x7f4   :  { %2371 = vrot.lane.b32.xlu0 %v5314_v11, %s4884_s28 }
 0x7f8   :  { %2369 = vrot.lane.b32.xlu0 %v5316_v13, %s4884_s28 }
 0x85f   :  { %v1885_v54 = vpop.xlane.xlu0 %1884 }
 0x860   :  { %v1889_v56 = vmul.f32 0.03125, %v1885_v54 }
 0x862   :  { %v1891_v57 = vadd.f32 1e-12, %v1889_v56 }
 0x863   :  { %v1888_v58 = vpop.xlane.xlu0 %1887 }
 0x864   :  { %4480 = vrsqrt.f32 %v1891_v57  ;;  %v1890_v59 = vmul.f32 0.03125, %v1888_v58  ;;  %v5425_v57 = vsel %vm2775_vm8, 1.0, %v4877_v34 }
 0x866   :  { %v1892_v3 = vadd.f32 1e-12, %v1890_v59 }
 0x867   :  { %v2208_v14 = vpop.permute.xlu0 %2207 }
 0x868   :  { %4482 = vrsqrt.f32 %v1892_v3  ;;  %4265 = vmatpush3.xpose.msk.msra.mxu0 %vm399_vm2, %v2208_v14 }
 0x869   :  { %4266 = vmatprep.subr.mxu0 %v4877_v34 }
 0x86b   :  { %v2372_v27 = vpop.permute.xlu0 %2371 }
 0x86c   :  { %4267 = vmatpush3.xpose.msk.msra.mxu0 %vm399_vm2, %v2206_v15 }
 0x86d   :  { %4278 = vmatprep.subr.mxu0 %v4877_v34 }
 0x86f   :  { %v2370_v37 = vpop.permute.xlu0 %2369 }
 0x871   :  { %v4481_v60 = vpop.eup %4480 }
 0x872   :  { %v1895_v62 = vmul.f32 %v4481_v60, %v1879_v0  ;;  %v3982_v60 = vadd.f32 -1.0, %v5425_v57 }
 0x874   :  { %v1901_v2 = vmul.f32 %v3943_v61, %v1895_v62 }
 0x875   :  { %v4483_v4 = vpop.eup %4482 }
 0x876   :  { %v1896_v5 = vmul.f32 %v4483_v4, %v1880_v40  ;;  %v1907_v6 = vadd.f32 %v3944_v63, %v1901_v2  ;;  %v2783_v4 = vmul.f32 1e+30, %v3982_v60 }
 0x878   :  { %v1902_v7 = vmul.f32 %v3943_v61, %v1896_v5  ;;  %4240 = vmatprep.mubr.msk.f32.mxu1 %vm261_vm0, %v1907_v6 }
 0x87a   :  { %v1908_v8 = vadd.f32 %v3944_v63, %v1902_v7 }
 0x87c   :  { %4241 = vmatmul.mubr.msk.f32.vlgmr.msra.gmra.mxu1 %vm261_vm0, %v1908_v8 }
 0x87d   :  { %4261 = vmatprep.mubr.msk.f32.mxu1 %vm4878_vm1, %v4877_v34  ;;  %4258 = vmatpush3.xpose.msk.msra.mxu1 %vm399_vm2, %v5314_v11 }
 0x87e   :  { %4259 = vmatprep.subr.mxu1 %v4877_v34 }
 0x881   :  { %4260 = vmatpush3.xpose.msk.msra.mxu1 %vm399_vm2, %v5316_v13 }
 0x882   :  { %4271 = vmatprep.subr.mxu1 %v4877_v34 }
 0x93c   :  { %v4242_v17 = vpop.f32.mrf.mxu1 }
 0x93d   :  { %v1998_v26 = vadd.f32 %v4242_v17, %v3945_v19 }
 0x93e   :  { %v1992_v20 = vpop.f32.mrf.mxu1 }
 0x93f   :  { %v1993_v22 = vadd.f32 %v3945_v19, %v1992_v20 }
 0x941   :  { %2367 = vrot.lane.b32.xlu0 %v1993_v22, %s4884_s28  ;;  %2203 = vrot.lane.b32.xlu1 %v1993_v22, %s4881_s9 }
 0x942   :  { %4262 = vmatmul.mubr.msk.f32.vlgmr.msra.gmra.mxu1 %vm399_vm2, %v1993_v22 }
 0x943   :  { %4272 = vmatpush3.xpose.msk.msra.mxu1 %vm399_vm2, %v2290_v21  ;;  %4275 = vmatprep.mubr.msk.f32.mxu1 %vm4878_vm1, %v4877_v34 }
 0x944   :  { %4273 = vmatprep.subr.mxu1 %v4877_v34 }
 0x945   :  { %2530 = vrot.lane.b32.xlu0 %v5344_v24, %s4881_s9  ;;  %2532 = vrot.lane.b32.xlu1 %v5340_v23, %s4881_s9 }
 0x947   :  { %4274 = vmatpush3.xpose.msk.msra.mxu1 %vm399_vm2, %v2288_v25 }
 0x948   :  { %4285 = vmatprep.subr.mxu1 %v4877_v34 }
 0x949   :  { %2528 = vrot.lane.b32.xlu0 %v1998_v26, %s4881_s9  ;;  %2285 = vrot.lane.b32.xlu1 %v1993_v22, %s4885_s12 }
 0x94d   :  { %2612 = vrot.lane.b32.xlu0 %v5344_v24, %s4885_s12  ;;  %2614 = vrot.lane.b32.xlu1 %v5340_v23, %s4885_s12 }
 0x951   :  { %2610 = vrot.lane.b32.xlu0 %v1998_v26, %s4885_s12  ;;  %2696 = vrot.lane.b32.xlu1 %v5340_v23, %s4884_s28 }
 0x955   :  { %2890 = vrot.lane.b32.xlu0 %v5314_v11, %s4879_s6  ;;  %2694 = vrot.lane.b32.xlu1 %v5344_v24, %s4884_s28 }
 0x959   :  { %2692 = vrot.lane.b32.xlu1 %v1998_v26, %s4884_s28 }
 0x95d   :  { %2888 = vrot.lane.b32.xlu1 %v5316_v13, %s4879_s6 }
 0x9b3   :  { %v2204_v29 = vpop.permute.xlu1 %2203  ;;  %v2368_v31 = vpop.permute.xlu0 %2367 }
 0x9b4   :  { %4269 = vmatmul.mubr.msk.f32.vlgmr.msra.gmra.mxu0 %vm399_vm2, %v2204_v29 }
 0x9b5   :  { %4279 = vmatpush3.xpose.msk.msra.mxu0 %vm399_vm2, %v2372_v27  ;;  %4282 = vmatprep.mubr.msk.f32.mxu0 %vm4878_vm1, %v4877_v34 }
 0x9b6   :  { %4280 = vmatprep.subr.mxu0 %v4877_v34 }
 0x9b7   :  { %v2533_v32 = vpop.permute.xlu1 %2532  ;;  %v2531_v33 = vpop.permute.xlu0 %2530 }
 0x9b9   :  { %4281 = vmatpush3.xpose.msk.msra.mxu0 %vm399_vm2, %v2370_v37 }
 0x9ba   :  { %4292 = vmatprep.subr.mxu0 %v4877_v34 }
 0x9bb   :  { %v2286_v35 = vpop.permute.xlu1 %2285  ;;  %v2529_v1 = vpop.permute.xlu0 %2528 }
 0x9bc   :  { %4283 = vmatmul.mubr.msk.f32.vlgmr.msra.gmra.mxu0 %vm399_vm2, %v2368_v31  ;;  %4276 = vmatmul.mubr.msk.f32.vlgmr.msra.gmra.mxu1 %vm399_vm2, %v2286_v35 }
 0x9bd   :  { %4286 = vmatpush3.xpose.msk.msra.mxu1 %vm399_vm2, %v5340_v23  ;;  %4293 = vmatpush3.xpose.msk.msra.mxu0 %vm399_vm2, %v2533_v32 }
 0x9be   :  { %4287 = vmatprep.subr.mxu1 %v4877_v34  ;;  %4294 = vmatprep.subr.mxu0 %v4877_v34 }
 0x9bf   :  { %v2615_v36 = vpop.permute.xlu1 %2614  ;;  %4289 = vmatprep.mubr.msk.f32.mxu1 %vm4878_vm1, %v4877_v34  ;;  %4296 = vmatprep.mubr.msk.f32.mxu0 %vm4878_vm1, %v4877_v34  ;;  %v2613_v38 = vpop.permute.xlu0 %2612 }
 0x9c1   :  { %4288 = vmatpush3.xpose.msk.msra.mxu1 %vm399_vm2, %v5344_v24  ;;  %4295 = vmatpush3.xpose.msk.msra.mxu0 %vm399_vm2, %v2531_v33 }
 0x9c2   :  { %4299 = vmatprep.subr.mxu1 %v4877_v34  ;;  %4306 = vmatprep.subr.mxu0 %v4877_v34 }
 0x9c3   :  { %v2697_v40 = vpop.permute.xlu1 %2696  ;;  %v2611_v0 = vpop.permute.xlu0 %2610 }
 0x9c4   :  { %4290 = vmatmul.mubr.msk.f32.vlgmr.msra.gmra.mxu1 %vm399_vm2, %v1998_v26  ;;  %4297 = vmatmul.mubr.msk.f32.vlgmr.msra.gmra.mxu0 %vm399_vm2, %v2529_v1 }
 0x9c5   :  { %4300 = vmatpush3.xpose.msk.msra.mxu1 %vm399_vm2, %v2615_v36  ;;  %4307 = vmatpush3.xpose.msk.msra.mxu0 %vm399_vm2, %v2697_v40 }
 0x9c6   :  { %4301 = vmatprep.subr.mxu1 %v4877_v34  ;;  %4308 = vmatprep.subr.mxu0 %v4877_v34 }
 0x9c7   :  { %v2695_v41 = vpop.permute.xlu1 %2694  ;;  %4303 = vmatprep.mubr.msk.f32.mxu1 %vm4878_vm1, %v4877_v34  ;;  %4310 = vmatprep.mubr.msk.f32.mxu0 %vm4878_vm1, %v4877_v34  ;;  %v2891_v43 = vpop.permute.xlu0 %2890 }
 0x9c9   :  { %4302 = vmatpush3.xpose.msk.msra.mxu1 %vm399_vm2, %v2613_v38  ;;  %4309 = vmatpush3.xpose.msk.msra.mxu0 %vm399_vm2, %v2695_v41 }
 0x9ca   :  { %4313 = vmatprep.subr.mxu1 %v4877_v34  ;;  %4327 = vmatprep.subr.mxu0 %v4877_v34 }
 0x9cb   :  { %v2693_v42 = vpop.permute.xlu1 %2692 }
 0x9cc   :  { %4304 = vmatmul.mubr.msk.f32.vlgmr.msra.gmra.mxu1 %vm399_vm2, %v2611_v0  ;;  %4311 = vmatmul.mubr.msk.f32.vlgmr.msra.gmra.mxu0 %vm399_vm2, %v2693_v42 }
 0x9cd   :  { %4314 = vmatpush3.msra.mxu1 %v2891_v43  ;;  %4317 = vmatprep.mubr.msk.f32.mxu1 %vm4878_vm1, %v4877_v34 }
 0x9ce   :  { %4315 = vmatprep.subr.mxu1 %v4877_v34  ;;  %4331 = vmatprep.mubr.msk.f32.mxu0 %vm4878_vm1, %v4877_v34 }
 0x9cf   :  { %v2889_v44 = vpop.permute.xlu1 %2888 }
 0x9d0   :  { %4316 = vmatpush3.msra.mxu1 %v2889_v44 }
 0x9d1   :  { %4320 = vmatprep.subr.mxu1 %v4877_v34 }
 0xa02   :  { %v2199_v48 = vpop.f32.mrf.mxu1 }
 0xa03   :  { %v2784_v55 = vadd.f32 %v2782_v47, %v2199_v48 }
 0xa04   :  { %v4263_v49 = vpop.f32.mrf.mxu1 }
 0xa05   :  { %v2792_v50 = vsel %vm1450_vm5, %v2784_v55, -inf }
 0xa06   :  { %2793 = vmax.xlane.f32.xlu0 %v2792_v50 }
 0xa74   :  { %v2281_v51 = vpop.f32.mrf.mxu0 }
 0xa75   :  { %v2785_v53 = vadd.f32 %v2782_v47, %v2281_v51 }
 0xa76   :  { %v4270_v54 = vpop.f32.mrf.mxu0 }
 0xa77   :  { %v2795_v56 = vsel %vm1450_vm5, %v2785_v53, -inf }
 0xa78   :  { %2796 = vmax.xlane.f32.xlu1 %v2795_v56 }
 0xa7c   :  { %v2445_v58 = vpop.f32.mrf.mxu0  ;;  %v2363_v59 = vpop.f32.mrf.mxu1 }
 0xa7d   :  { %v2786_v3 = vadd.f32 %v2782_v47, %v2363_v59  ;;  %v2787_v63 = vadd.f32 %v2782_v47, %v2445_v58 }
 0xa7e   :  { %v4284_v61 = vpop.f32.mrf.mxu0  ;;  %v4277_v62 = vpop.f32.mrf.mxu1 }
 0xa7f   :  { %v2798_v2 = vsel %vm1450_vm5, %v2786_v3, -inf  ;;  %v2801_v5 = vsel %vm1450_vm5, %v2787_v63, -inf }
 0xa80   :  { %2799 = vmax.xlane.f32.xlu0 %v2798_v2 }
 0xa84   :  { %v2524_v6 = vpop.f32.mrf.mxu1  ;;  %v2606_v7 = vpop.f32.mrf.mxu0  ;;  %2802 = vmax.xlane.f32.xlu0 %v2801_v5 }
 0xa85   :  { %v2788_v8 = vadd.f32 %v2783_v4, %v2524_v6  ;;  %v5436_v20 = vadd.f32 %v2783_v4, %v2606_v7 }
 0xa86   :  { %v4291_v9 = vpop.f32.mrf.mxu1  ;;  %v4298_v10 = vpop.f32.mrf.mxu0 }
 0xa87   :  { %v2804_v12 = vsel %vm1450_vm5, %v2788_v8, -inf  ;;  %v2807_v22 = vsel %vm1450_vm5, %v5436_v20, -inf }
 0xa88   :  { %2805 = vmax.xlane.f32.xlu0 %v2804_v12 }
 0xa89   :  { %2969 = vrot.lane.b32.xlu1 %v5314_v11, %s4880_s22 }
 0xa8c   :  { %v2688_v14 = vpop.f32.mrf.mxu1  ;;  %v2770_v15 = vpop.f32.mrf.mxu0 }
 0xa8d   :  { %v2790_v16 = vadd.f32 %v2783_v4, %v2688_v14  ;;  %v5440_v21 = vadd.f32 %v2783_v4, %v2770_v15 }
 0xa8e   :  { %v4305_v17 = vpop.f32.mrf.mxu1  ;;  %v4312_v18 = vpop.f32.mrf.mxu0 }
 0xa8f   :  { %v2810_v19 = vsel %vm1450_vm5, %v2790_v16, -inf  ;;  %v2813_v25 = vsel %vm1450_vm5, %v5440_v21, -inf  ;;  %v2794_v26 = vpop.xlane.xlu0 %2793 }
 0xa90   :  { %2811 = vmax.xlane.f32.xlu0 %v2810_v19  ;;  %v2816_v27 = vsub.f32 %v2784_v55, %v2794_v26 }
 0xa92   :  { %v2824_v37 = vmul.f32 1.442695, %v2816_v27 }
 0xa94   :  { %4484 = vpow2.f32 %v2824_v37 }
 0xaa1   :  { %v5456_v29 = vpop.eup %4484 }
 0xaa2   :  { %v2840_v31 = vsel %vm1450_vm5, %v5456_v29, 0.0 }
 0xaa6   :  { %3048 = vrot.lane.b32.xlu0 %v5314_v11, %s4883_s27 }
 0xaaa   :  { %3046 = vrot.lane.b32.xlu0 %v5316_v13, %s4883_s27 }
 0xaad   :  { %2808 = vmax.xlane.f32.xlu1 %v2807_v22 }
 0xaae   :  { %3221 = vrot.lane.b32.xlu0 %v5340_v23, %s4879_s6 }
 0xab1   :  { %2814 = vmax.xlane.f32.xlu1 %v2813_v25 }
 0xab2   :  { %3219 = vrot.lane.b32.xlu0 %v5344_v24, %s4879_s6 }
 0xac2   :  { %2967 = vrot.lane.b32.xlu1 %v5316_v13, %s4880_s22 }
 0xac6   :  { %3127 = vrot.lane.b32.xlu1 %v5314_v11, %s4882_s26 }
 0xaca   :  { %3125 = vrot.lane.b32.xlu1 %v5316_v13, %s4882_s26 }
 0xace   :  { %3300 = vrot.lane.b32.xlu1 %v5340_v23, %s4880_s22 }
 0xad1   :  { %2841 = vadd.xlane.f32.xlu0 %v2840_v31 }
 0xad2   :  { %3298 = vrot.lane.b32.xlu1 %v5344_v24, %s4880_s22 }
 0xad6   :  { %3458 = vrot.lane.b32.xlu1 %v5340_v23, %s4882_s26 }
 0xae7   :  { %3379 = vrot.lane.b32.xlu0 %v5340_v23, %s4883_s27 }
 0xb01   :  { %v2797_v11 = vpop.xlane.xlu1 %2796 }
 0xb02   :  { %v2817_v13 = vsub.f32 %v2785_v53, %v2797_v11 }
 0xb04   :  { %v2826_v32 = vmul.f32 1.442695, %v2817_v13 }
 0xb05   :  { %v2970_v58 = vpop.permute.xlu1 %2969 }
 0xb06   :  { %4486 = vpow2.f32 %v2826_v32 }
 0xb09   :  { %v2800_v33 = vpop.xlane.xlu0 %2799 }
 0xb0a   :  { %v2818_v35 = vsub.f32 %v2786_v3, %v2800_v33 }
 0xb0c   :  { %v2828_v1 = vmul.f32 1.442695, %v2818_v35 }
 0xb0d   :  { %v2803_v36 = vpop.xlane.xlu0 %2802 }
 0xb0e   :  { %4488 = vpow2.f32 %v2828_v1  ;;  %v2819_v38 = vsub.f32 %v2787_v63, %v2803_v36 }
 0xb10   :  { %v2830_v40 = vmul.f32 1.442695, %v2819_v38 }
 0xb11   :  { %v2806_v0 = vpop.xlane.xlu0 %2805 }
 0xb12   :  { %4490 = vpow2.f32 %v2830_v40  ;;  %v2820_v41 = vsub.f32 %v2788_v8, %v2806_v0 }
 0xb13   :  { %v5468_v42 = vpop.eup %4486 }
 0xb14   :  { %v2832_v43 = vmul.f32 1.442695, %v2820_v41  ;;  %v2843_v23 = vsel %vm1450_vm5, %v5468_v42, 0.0 }
 0xb15   :  { %2844 = vadd.xlane.f32.xlu1 %v2843_v23 }
 0xb16   :  { %4492 = vpow2.f32 %v2832_v43 }
 0xb19   :  { %v2812_v44 = vpop.xlane.xlu0 %2811 }
 0xb1a   :  { %v2822_v45 = vsub.f32 %v2790_v16, %v2812_v44 }
 0xb1b   :  { %v5472_v39 = vpop.eup %4488 }
 0xb1c   :  { %v2836_v47 = vmul.f32 1.442695, %v2822_v45  ;;  %v2846_v48 = vsel %vm1450_vm5, %v5472_v39, 0.0 }
 0xb1d   :  { %v3049_v55 = vpop.permute.xlu0 %3048  ;;  %2847 = vadd.xlane.f32.xlu0 %v2846_v48 }
 0xb1e   :  { %4494 = vpow2.f32 %v2836_v47  ;;  %4328 = vmatpush3.msra.mxu0 %v3049_v55 }
 0xb1f   :  { %v5476_v49 = vpop.eup %4490  ;;  %4329 = vmatprep.subr.mxu0 %v4877_v34 }
 0xb20   :  { %v2849_v50 = vsel %vm1450_vm5, %v5476_v49, 0.0 }
 0xb21   :  { %v3047_v51 = vpop.permute.xlu0 %3046  ;;  %2850 = vadd.xlane.f32.xlu1 %v2849_v50 }
 0xb22   :  { %4330 = vmatpush3.msra.mxu0 %v3047_v51 }
 0xb23   :  { %v5481_v52 = vpop.eup %4492  ;;  %4341 = vmatprep.subr.mxu0 %v4877_v34 }
 0xb24   :  { %v2852_v53 = vsel %vm1450_vm5, %v5481_v52, 0.0 }
 0xb25   :  { %2853 = vadd.xlane.f32.xlu0 %v2852_v53  ;;  %v3222_v7 = vpop.permute.xlu0 %3221  ;;  %v3553_v53 = vld [vmem:[#allocation20 + $0x18] sm:$0xff] }
 0xb29   :  { %v3220_v8 = vpop.permute.xlu0 %3219 }
 0xb2b   :  { %v5486_v54 = vpop.eup %4494 }
 0xb2c   :  { %v2858_v56 = vsel %vm1450_vm5, %v5486_v54, 0.0 }
 0xb2d   :  { %2859 = vadd.xlane.f32.xlu0 %v2858_v56 }
 0xb36   :  { %v2809_v59 = vpop.xlane.xlu1 %2808 }
 0xb37   :  { %v2821_v3 = vsub.f32 %v5436_v20, %v2809_v59 }
 0xb39   :  { %v2834_v60 = vmul.f32 1.442695, %v2821_v3 }
 0xb3a   :  { %v2815_v61 = vpop.xlane.xlu1 %2814 }
 0xb3b   :  { %4496 = vpow2.f32 %v2834_v60  ;;  %v2823_v62 = vsub.f32 %v5440_v21, %v2815_v61 }
 0xb3d   :  { %v2838_v63 = vmul.f32 1.442695, %v2823_v62  ;;  %v3552_v62 = vld [vmem:[#allocation20 + $0x10] sm:$0xff] }
 0xb3e   :  { %v2968_v15 = vpop.permute.xlu1 %2967 }
 0xb3f   :  { %4498 = vpow2.f32 %v2838_v63  ;;  %v3551_v63 = vld [vmem:[#allocation20 + $0x8] sm:$0xff] }
 0xb42   :  { %v3128_v16 = vpop.permute.xlu1 %3127 }
 0xb43   :  { %3377 = vrot.lane.b32.xlu0 %v5344_v24, %s4883_s27 }
 0xb46   :  { %v3126_v17 = vpop.permute.xlu1 %3125 }
 0xb48   :  { %v5494_v2 = vpop.eup %4496 }
 0xb49   :  { %v2855_v4 = vsel %vm1450_vm5, %v5494_v2, 0.0 }
 0xb4a   :  { %2856 = vadd.xlane.f32.xlu1 %v2855_v4 }
 0xb4c   :  { %v5498_v5 = vpop.eup %4498 }
 0xb4d   :  { %v2861_v6 = vsel %vm1450_vm5, %v5498_v5, 0.0 }
 0xb4e   :  { %2862 = vadd.xlane.f32.xlu1 %v2861_v6 }
 0xb5a   :  { %v2842_v9 = vpop.xlane.xlu0 %2841 }
 0xb5b   :  { %4500 = vrcp.f32 %v2842_v9 }
 0xb5e   :  { %v3380_v21 = vpop.permute.xlu0 %3379 }
 0xb5f   :  { %3456 = vrot.lane.b32.xlu1 %v5344_v24, %s4882_s26  ;;  %v3301_v24 = vpop.permute.xlu1 %3300 }
 0xb63   :  { %v3299_v18 = vpop.permute.xlu1 %3298 }
 0xb67   :  { %v3459_v19 = vpop.permute.xlu1 %3458 }
 0xb68   :  { %v4501_v10 = vpop.eup %4500 }
 0xb69   :  { %v2872_v12 = vmul.f32 %v4501_v10, %v5456_v29 }
 0xb6b   :  { %v2880_v14 = vmul.f32 %v5419_v46, %v2872_v12 }
 0xb6d   :  { %4318 = vmatmul.mubr.msk.f32.vlgmr.msra.gmra.mxu1 %vm1450_vm5, %v2880_v14 }
 0xb6e   :  { %4321 = vmatpush3.msra.mxu1 %v2970_v58  ;;  %4324 = vmatprep.mubr.msk.f32.mxu1 %vm4878_vm1, %v4877_v34 }
 0xb6f   :  { %4322 = vmatprep.subr.mxu1 %v4877_v34 }
 0xb70   :  { %4323 = vmatpush3.msra.mxu1 %v2968_v15 }
 0xb71   :  { %4334 = vmatprep.subr.mxu1 %v4877_v34 }
 0xb9e   :  { %v2845_v20 = vpop.xlane.xlu1 %2844 }
 0xb9f   :  { %4502 = vrcp.f32 %v2845_v20 }
 0xba6   :  { %v2848_v22 = vpop.xlane.xlu0 %2847 }
 0xba7   :  { %4504 = vrcp.f32 %v2848_v22  ;;  %v3993_v22 = vld [vmem:[#allocation22] ss:$0 sm:$0xff] }
 0xbaa   :  { %v2851_v25 = vpop.xlane.xlu1 %2850 }
 0xbab   :  { %4506 = vrcp.f32 %v2851_v25 }
 0xbac   :  { %v4503_v26 = vpop.eup %4502 }
 0xbad   :  { %v2873_v27 = vmul.f32 %v4503_v26, %v5468_v42 }
 0xbae   :  { %v2854_v37 = vpop.xlane.xlu0 %2853 }
 0xbaf   :  { %4508 = vrcp.f32 %v2854_v37  ;;  %v2881_v29 = vmul.f32 %v5419_v46, %v2873_v27 }
 0xbb1   :  { %4325 = vmatmul.mubr.msk.f32.vlgmr.msra.gmra.mxu1 %vm1450_vm5, %v2881_v29 }
 0xbb2   :  { %4335 = vmatpush3.msra.mxu1 %v3128_v16  ;;  %4338 = vmatprep.mubr.msk.f32.mxu1 %vm4878_vm1, %v4877_v34 }
 0xbb3   :  { %4336 = vmatprep.subr.mxu1 %v4877_v34 }
 0xbb4   :  { %v4505_v31 = vpop.eup %4504  ;;  %4337 = vmatpush3.msra.mxu1 %v3126_v17 }
 0xbb5   :  { %v2874_v11 = vmul.f32 %v4505_v31, %v5472_v39  ;;  %4348 = vmatprep.subr.mxu1 %v4877_v34 }
 0xbb6   :  { %v2860_v13 = vpop.xlane.xlu0 %2859 }
 0xbb7   :  { %4510 = vrcp.f32 %v2860_v13  ;;  %v2882_v32 = vmul.f32 %v5419_v46, %v2874_v11 }
 0xbb8   :  { %v4507_v33 = vpop.eup %4506 }
 0xbb9   :  { %4332 = vmatmul.mubr.msk.f32.vlgmr.msra.gmra.mxu0 %vm1450_vm5, %v2882_v32  ;;  %v2875_v35 = vmul.f32 %v4507_v33, %v5476_v49 }
 0xbba   :  { %4342 = vmatpush3.msra.mxu0 %v3222_v7  ;;  %4345 = vmatprep.mubr.msk.f32.mxu0 %vm4878_vm1, %v4877_v34 }
 0xbbb   :  { %4343 = vmatprep.subr.mxu0 %v4877_v34  ;;  %v2883_v1 = vmul.f32 %v5419_v46, %v2875_v35  ;;  %v3378_v46 = vpop.permute.xlu0 %3377 }
 0xbbc   :  { %v4509_v36 = vpop.eup %4508  ;;  %4344 = vmatpush3.msra.mxu0 %v3220_v8 }
 0xbbd   :  { %4339 = vmatmul.mubr.msk.f32.vlgmr.msra.gmra.mxu1 %vm1450_vm5, %v2883_v1  ;;  %4355 = vmatprep.subr.mxu0 %v4877_v34  ;;  %v2876_v38 = vmul.f32 %v4509_v36, %v5481_v52 }
 0xbbe   :  { %4349 = vmatpush3.msra.mxu1 %v3301_v24  ;;  %4352 = vmatprep.mubr.msk.f32.mxu1 %vm4878_vm1, %v4877_v34 }
 0xbbf   :  { %4350 = vmatprep.subr.mxu1 %v4877_v34  ;;  %v2884_v40 = vmul.f32 %v5425_v57, %v2876_v38 }
 0xbc0   :  { %4351 = vmatpush3.msra.mxu1 %v3299_v18 }
 0xbc1   :  { %4346 = vmatmul.mubr.msk.f32.vlgmr.msra.gmra.mxu0 %vm1450_vm5, %v2884_v40  ;;  %4362 = vmatprep.subr.mxu1 %v4877_v34 }
 0xbc2   :  { %4356 = vmatpush3.msra.mxu0 %v3380_v21  ;;  %4359 = vmatprep.mubr.msk.f32.mxu0 %vm4878_vm1, %v4877_v34 }
 0xbc3   :  { %4357 = vmatprep.subr.mxu0 %v4877_v34 }
 0xbc4   :  { %v4511_v0 = vpop.eup %4510  ;;  %4358 = vmatpush3.msra.mxu0 %v3378_v46  ;;  %v3689_v46 = vld [vmem:[#allocation23 + $0x18] sm:$0xff] }
 0xbc5   :  { %v2878_v41 = vmul.f32 %v4511_v0, %v5486_v54  ;;  %4369 = vmatprep.subr.mxu0 %v3553_v53  ;;  %v3688_v0 = vld [vmem:[#allocation23 + $0x10] sm:$0xff] }
 0xbc7   :  { %v2886_v42 = vmul.f32 %v5425_v57, %v2878_v41  ;;  %v3687_v41 = vld [vmem:[#allocation23 + $0x8] sm:$0xff] }
 0xbc9   :  { %4360 = vmatmul.mubr.msk.f32.vlgmr.msra.gmra.mxu0 %vm1450_vm5, %v2886_v42  ;;  %v3686_v42 = vld [vmem:[#allocation23] sm:$0xff] }
 0xbca   :  { %4370 = vmatpush3.msra.mxu0 %v3553_v53 }
 0xbcb   :  { %4371 = vmatprep.subr.mxu0 %v3552_v62 }
 0xbcc   :  { %4372 = vmatpush3.msra.mxu0 %v3552_v62  ;;  %v3781_v62 = vld [vmem:[%s5635_s18 + $0x8] sm:$0xff] }
 0xbcd   :  { %4373 = vmatprep.subr.mxu0 %v3551_v63 }
 0xbce   :  { %4374 = vmatpush3.msra.mxu0 %v3551_v63  ;;  %v3780_v63 = vld [vmem:[%s5635_s18] sm:$0xff] }
 0xbd3   :  { %v2857_v43 = vpop.xlane.xlu1 %2856 }
 0xbd4   :  { %4512 = vrcp.f32 %v2857_v43  ;;  %v3787_v43 = vld [vmem:[%s5635_s18 + $0x38] sm:$0xff] }
 0xbd7   :  { %v2863_v23 = vpop.xlane.xlu1 %2862 }
 0xbd8   :  { %4514 = vrcp.f32 %v2863_v23  ;;  %v3786_v23 = vld [vmem:[%s5635_s18 + $0x30] sm:$0xff] }
 0xbdb   :  { %v3457_v55 = vpop.permute.xlu1 %3456 }
 0xbe1   :  { %v4513_v44 = vpop.eup %4512 }
 0xbe2   :  { %v2877_v45 = vmul.f32 %v4513_v44, %v5494_v2  ;;  %v3550_v2 = vld [vmem:[#allocation20] sm:$0xff]  ;;  %v3785_v44 = vld [vmem:[%s5635_s18 + $0x28] sm:$0xff] }
 0xbe3   :  { %4375 = vmatprep.subr.mxu0 %v3550_v2 }
 0xbe4   :  { %v2885_v39 = vmul.f32 %v5425_v57, %v2877_v45  ;;  %4376 = vmatpush3.msra.mxu0 %v3550_v2  ;;  %v3784_v45 = vld [vmem:[%s5635_s18 + $0x20] sm:$0xff]  ;;  %v3996_v2 = vld [vmem:[#allocation25] ss:$0 sm:$0xff] }
 0xbe5   :  { %v4515_v47 = vpop.eup %4514  ;;  %4391 = vmatprep.subr.mxu0 %v3787_v43 }
 0xbe6   :  { %4353 = vmatmul.mubr.msk.f32.vlgmr.msra.gmra.mxu1 %vm1450_vm5, %v2885_v39  ;;  %v2879_v48 = vmul.f32 %v4515_v47, %v5498_v5 }
 0xbe7   :  { %4363 = vmatpush3.msra.mxu1 %v3459_v19  ;;  %4366 = vmatprep.mubr.msk.f32.mxu1 %vm4878_vm1, %v4877_v34 }
 0xbe8   :  { %4364 = vmatprep.subr.mxu1 %v4877_v34  ;;  %v2887_v49 = vmul.f32 %v5425_v57, %v2879_v48 }
 0xbe9   :  { %4365 = vmatpush3.msra.mxu1 %v3457_v55 }
 0xbea   :  { %4367 = vmatmul.mubr.msk.f32.vlgmr.msra.gmra.mxu1 %vm1450_vm5, %v2887_v49  ;;  %4380 = vmatprep.subr.mxu1 %v3689_v46 }
 0xbeb   :  { %4381 = vmatpush3.msra.mxu1 %v3689_v46 }
 0xbec   :  { %4382 = vmatprep.subr.mxu1 %v3688_v0 }
 0xbed   :  { %4383 = vmatpush3.msra.mxu1 %v3688_v0 }
 0xbee   :  { %4384 = vmatprep.subr.mxu1 %v3687_v41 }
 0xbef   :  { %4385 = vmatpush3.msra.mxu1 %v3687_v41 }
 0xbf0   :  { %4386 = vmatprep.subr.mxu1 %v3686_v42 }
 0xbf1   :  { %4387 = vmatpush3.msra.mxu1 %v3686_v42 }
 0xc2d   :  { %v2963_v50 = vpop.f32.mrf.mxu1 }
 0xc2f   :  { %v4319_v51 = vpop.f32.mrf.mxu1 }
 0xc71   :  { %v3042_v52 = vpop.f32.mrf.mxu1 }
 0xc72   :  { %3205 = vrot.lane.b32.xlu0 %v3042_v52, %s4861_s3  ;;  %v3994_v52 = vld [vmem:[#allocation8 + $0x2] ss:$0 sm:$0xff] }
 0xc73   :  { %v4326_v54 = vpop.f32.mrf.mxu1 }
 0xc74   :  { %v3995_v54 = vld [vmem:[#allocation10 + $0x2] ss:$0 sm:$0xff] }
 0xc79   :  { %v3121_v56 = vpop.f32.mrf.mxu0 }
 0xc7a   :  { %3209 = vrot.lane.b32.xlu1 %v3121_v56, %s4869_s16 }
 0xc7b   :  { %v4333_v58 = vpop.f32.mrf.mxu0 }
 0xc7d   :  { %v3200_v59 = vpop.f32.mrf.mxu1 }
 0xc7e   :  { %3213 = vrot.lane.b32.xlu1 %v3200_v59, %s4890_s21 }
 0xc7f   :  { %v4340_v34 = vpop.f32.mrf.mxu1 }
 0xc81   :  { %v3294_v57 = vpop.f32.mrf.mxu0 }
 0xc83   :  { %v4347_v3 = vpop.f32.mrf.mxu0 }
 0xc89   :  { %v3452_v60 = vpop.f32.mrf.mxu0 }
 0xc8b   :  { %v4361_v61 = vpop.f32.mrf.mxu0 }
 0xc8c   :  { %v3782_v61 = vld [vmem:[%s5635_s18 + $0x10] sm:$0xff] }
 0xca6   :  { %v3373_v4 = vpop.f32.mrf.mxu1 }
 0xca7   :  { %3536 = vrot.lane.b32.xlu0 %v3373_v4, %s4861_s3 }
 0xca8   :  { %v4354_v5 = vpop.f32.mrf.mxu1 }
 0xcaa   :  { %v3531_v6 = vpop.f32.mrf.mxu1 }
 0xcab   :  { %3544 = vrot.lane.b32.xlu1 %v3531_v6, %s4890_s21  ;;  %3540 = vrot.lane.b32.xlu0 %v3452_v60, %s4869_s16  ;;  %v3783_v60 = vld [vmem:[%s5635_s18 + $0x18] sm:$0xff]  ;;  %s4891_s18 = smov [#allocation26]  }
 0xcac   :  { %v4368_v7 = vpop.f32.mrf.mxu1  ;;  %s3888_s8 = sshll.u32 %s4891_s18, 4  ;;  %s3889_s8 = int_to_ptr.vmem [resolvable:$true] %s3888_s8 }
 0xcad   :  { %s4820_s1 = scalar_lea.vmem %s3889_s8, 256  ;;  %p4825_p6 = scmp.lt.s32.totalorder %s3889_s8, %s3889_s8 }
 0xcae   :  { %p4821_p5 = scmp.ne.s32.totalorder %s3889_s8, %s4820_s1  ;;  %p4826_p7 = scmp.lt.s32.totalorder %s4820_s1, %s4820_s1 }
 0xcb0   :  { %p4827_p8 = por %p4826_p7, %p4825_p6 }
 0xcb2   :  { %p4828_p9 = pnand %p4827_p8, %p4821_p5 }
 0xce4   :  { %v3206_v8 = vpop.permute.xlu0 %3205 }
 0xce5   :  { %v3216_v10 = vsel %vm399_vm2, %v2963_v50, %v3206_v8 }
 0xcec   :  { %v3210_v9 = vpop.permute.xlu1 %3209 }
 0xced   :  { %v3217_v12 = vsel %vm1450_vm5, %v3216_v10, %v3210_v9 }
 0xcf0   :  { %v3214_v14 = vpop.permute.xlu1 %3213 }
 0xcf1   :  { %v3218_v15 = vsel %vm1452_vm6, %v3217_v12, %v3214_v14  ;;  %v4001_v12 = vld [vmem:[%s5636_s19] ss:$0 sm:$0xff] }
 0xcf2   :  { %4377 = vmatprep.mubr.msk.f32.mxu0 %vm261_vm0, %v3218_v15 }
 0xd19   :  { %v3537_v16 = vpop.permute.xlu0 %3536 }
 0xd1a   :  { %v3547_v17 = vsel %vm399_vm2, %v3294_v57, %v3537_v16 }
 0xd1d   :  { %v3545_v24 = vpop.permute.xlu1 %3544  ;;  %v3541_v18 = vpop.permute.xlu0 %3540 }
 0xd1e   :  { %v3548_v19 = vsel %vm1450_vm5, %v3547_v17, %v3541_v18 }
 0xd1f   :  { %v3549_v20 = vsel %vm1452_vm6, %v3548_v19, %v3545_v24 }
 0xd20   :  { %4378 = vmatmul.mubr.msk.f32.vlgmr.msra.gmra.mxu0 %vm261_vm0, %v3549_v20 }
 0xd21   :  { %4392 = vmatpush3.msra.mxu0 %v3787_v43 }
 0xd22   :  { %4393 = vmatprep.subr.mxu0 %v3786_v23 }
 0xd23   :  { %4394 = vmatpush3.msra.mxu0 %v3786_v23 }
 0xd24   :  { %4395 = vmatprep.subr.mxu0 %v3785_v44 }
 0xd25   :  { %4396 = vmatpush3.msra.mxu0 %v3785_v44 }
 0xd26   :  { %4397 = vmatprep.subr.mxu0 %v3784_v45 }
 0xd27   :  { %4398 = vmatpush3.msra.mxu0 %v3784_v45 }
 0xd28   :  { %4399 = vmatprep.subr.mxu0 %v3783_v60 }
 0xd29   :  { %4400 = vmatpush3.msra.mxu0 %v3783_v60 }
 0xd2a   :  { %4401 = vmatprep.subr.mxu0 %v3782_v61 }
 0xd2b   :  { %4402 = vmatpush3.msra.mxu0 %v3782_v61 }
 0xd2c   :  { %4403 = vmatprep.subr.mxu0 %v3781_v62 }
 0xd2d   :  { %4404 = vmatpush3.msra.mxu0 %v3781_v62 }
 0xd2e   :  { %4405 = vmatprep.subr.mxu0 %v3780_v63 }
 0xd2f   :  { %4406 = vmatpush3.msra.mxu0 %v3780_v63 }
 0xde0   :  { %v4379_v21 = vpop.f32.mrf.mxu0 }
 0xde1   :  { %v3636_v25 = vadd.f32 %v4379_v21, %v5277_v28 }
 0xde2   :  { %v3626_v26 = vpop.f32.mrf.mxu0 }
 0xde3   :  { %v5565_v27 = vadd.f32 %v3993_v22, %v3636_v25  ;;  %v3635_v37 = vadd.f32 %v3626_v26, %v5280_v30 }
 0xde5   :  { %v5568_v29 = vadd.f32 %v3993_v22, %v3635_v37  ;;  %v3651_v31 = vsel %vm261_vm0, %v5565_v27, 0.0 }
 0xde6   :  { %3652 = vadd.xlane.f32.xlu1 %v3651_v31 }
 0xde7   :  { %v3648_v11 = vsel %vm261_vm0, %v5568_v29, 0.0 }
 0xde8   :  { %3649 = vadd.xlane.f32.xlu0 %v3648_v11 }
 0xe6f   :  { %v3653_v13 = vpop.xlane.xlu1 %3652 }
 0xe70   :  { %v3655_v32 = vmul.f32 0.03125, %v3653_v13 }
 0xe71   :  { %v3650_v33 = vpop.xlane.xlu0 %3649 }
 0xe72   :  { %v3654_v35 = vmul.f32 0.03125, %v3650_v33  ;;  %v3657_v28 = vsub.f32 %v5565_v27, %v3655_v32 }
 0xe74   :  { %v3656_v1 = vsub.f32 %v5568_v29, %v3654_v35  ;;  %v3659_v38 = vmul.f32 %v3657_v28, %v3657_v28 }
 0xe76   :  { %v3658_v36 = vmul.f32 %v3656_v1, %v3656_v1  ;;  %v3663_v40 = vsel %vm261_vm0, %v3659_v38, 0.0 }
 0xe78   :  { %v3660_v30 = vsel %vm261_vm0, %v3658_v36, 0.0 }
 0xe79   :  { %3661 = vadd.xlane.f32.xlu0 %v3660_v30 }
 0xe7d   :  { %3664 = vadd.xlane.f32.xlu0 %v3663_v40 }
 0xf02   :  { %v3662_v39 = vpop.xlane.xlu0 %3661 }
 0xf03   :  { %v3666_v47 = vmul.f32 0.03125, %v3662_v39 }
 0xf05   :  { %v3668_v48 = vadd.f32 1e-12, %v3666_v47 }
 0xf06   :  { %v3665_v55 = vpop.xlane.xlu0 %3664 }
 0xf07   :  { %4516 = vrsqrt.f32 %v3668_v48  ;;  %v3667_v49 = vmul.f32 0.03125, %v3665_v55 }
 0xf09   :  { %v3669_v50 = vadd.f32 1e-12, %v3667_v49 }
 0xf0b   :  { %4518 = vrsqrt.f32 %v3669_v50 }
 0xf14   :  { %v4517_v51 = vpop.eup %4516 }
 0xf15   :  { %v3672_v53 = vmul.f32 %v4517_v51, %v3656_v1 }
 0xf17   :  { %v3678_v56 = vmul.f32 %v3994_v52, %v3672_v53 }
 0xf18   :  { %v4519_v58 = vpop.eup %4518 }
 0xf19   :  { %v3673_v59 = vmul.f32 %v4519_v58, %v3657_v28  ;;  %v3684_v34 = vadd.f32 %v3995_v54, %v3678_v56 }
 0xf1b   :  { %v3679_v57 = vmul.f32 %v3994_v52, %v3673_v59  ;;  %4388 = vmatprep.mubr.msk.f32.mxu1 %vm261_vm0, %v3684_v34 }
 0xf1d   :  { %v3685_v3 = vadd.f32 %v3995_v54, %v3679_v57 }
 0xf1f   :  { %4389 = vmatmul.mubr.msk.f32.vlgmr.msra.gmra.mxu1 %vm261_vm0, %v3685_v3 }
 0xfdf   :  { %v4390_v4 = vpop.f32.mrf.mxu1 }
 0xfe0   :  { %v3775_v5 = vadd.f32 %v4390_v4, %v3996_v2 }
 0xfe1   :  { %v3769_v6 = vpop.f32.mrf.mxu1 }
 0xfe2   :  { %v3770_v7 = vadd.f32 %v3996_v2, %v3769_v6  ;;  %v3779_v9 = vmax.f32 %v3775_v5, 0.0 }
 0xfe4   :  { %v3778_v8 = vmax.f32 %v3770_v7, 0.0 }
 0xfe6   :  { %4407 = vmatprep.mubr.msk.f32.mxu0 %vm3788_vm9, %v3778_v8 }
 0xfe7   :  { %4408 = vmatmul.mubr.msk.f32.vlgmr.msra.gmra.mxu0 %vm3788_vm9, %v3779_v9 }
0x10a7   :  { %v4409_v10 = vpop.f32.mrf.mxu0 }
0x10a8   :  { %v3871_v14 = vadd.f32 %v4409_v10, %v5565_v27 }
0x10a9   :  { %v3861_v15 = vpop.f32.mrf.mxu0 }
0x10aa   :  { %v3880_v16 = vadd.f32 %v4001_v12, %v3871_v14  ;;  %v3870_v17 = vadd.f32 %v3861_v15, %v5568_v29 }
0x10ac   :  { %3882 = vst.msk [vmem:[#allocation26 + $0x8] sm:$0xff] %vm261_vm0, %v3880_v16  ;;  %v3879_v24 = vadd.f32 %v4001_v12, %v3870_v17 }
0x10ae   :  { %3881 = vst.msk [vmem:[#allocation26] sm:$0xff] %vm261_vm0, %v3879_v24 }
0x10af   :  { %4831 = shalt.err (!%p4828_p9)
}
0x10b0   :  { %s5650_s5 = sld [smem:[#allocation41_spill]] }
0x10b6   :  { %3894 = dma.vmem_to_hbm [thread:$0]  %s3889_s8, 256, %s5650_s5, [#allocation4], %s4860_s25, %s4860_s25, %s4861_s3  }
0x10b7   :  { %4856 = dma.done.wait [#allocation4], 256  }
0x10b8   :  { %4857 = vsyncadd [#allocation4], 4294967040 }
0x10b9   :  { %3898 = vsyncpa [#allocation3], 1 }
0x10ba   :  { %3899 = vsyncpa [#allocation6], 1 }
0x10bb   :  { %3900 = vsyncpa [#allocation9], 1 }
0x10bc   :  { %3901 = vsyncpa [#allocation12], 1 }
0x10bd   :  { %3902 = vsyncpa [#allocation15], 1 }
0x10be   :  { %3903 = vsyncpa [#allocation18], 1 }
0x10bf   :  { %3904 = vsyncpa [#allocation21], 1 }
0x10c0   :  { %3905 = vsyncpa [#allocation24], 1 }
0x10c1   :  { %3906 = vsyncpa [#allocation4], 1 }

</bundles_post_ra>
